<compile_context>
chip_gen: v7x
topology: tpu7x:2x2x1
jax: 0.10.0
libtpu: 0.0.40
codegen_flags: <defaults>
</compile_context>

<pallas_src>
import functools

import jax
import jax.numpy as jnp
from jax.experimental import pallas as pl
from jax.experimental.pallas import tpu as pltpu

IN_DIM = 6
E_H = 27
E_OUT = 27
N_OUT = 2


def _graph_gnn_kernel(
    wind_ref,      # SMEM (4,): [mean_speed, mean_direc, std_speed, std_direc]
    feat_ref,      # (1, TB*E, 2*D+2) block: [x_src | x_tgt | ea_norm], flat (batch, edge)
    ea_ref,        # (TB*E, 2): raw (dist, direc), tiled TB times (broadcast across grid)
    scat_ref,      # (TB, N, E): signed one-hot scatter tensor (broadcast across grid)
    w1_ref,        # (2*D+4, E_H): rows [0:2D+2]=W1_feat, [2D+2]=w1_edge_weight, [2D+3]=b1
    w2_ref,        # (E_H+1, E_OUT): rows [0:E_H]=W2, [E_H]=b2
    w3_ref,        # (E_OUT+1, N_OUT): rows [0:E_OUT]=W3, [E_OUT]=b3
    o_ref,         # (TB, N, N_OUT) output block
):
    tb, n_nodes, n_edges = scat_ref.shape
    f1 = feat_ref.shape[2]                 # 2*D + 2
    d = (f1 - 2) // 2
    e_h = w2_ref.shape[0] - 1
    e_out = w3_ref.shape[0] - 1
    n_out = w3_ref.shape[1]

    feat = feat_ref[0]                     # (TB*E, 2*D+2)
    ea = ea_ref[...]                       # (TB*E, 2)

    # --- edge weight: relu(3 * speed * cos(|city_direc - wind_direc|) / dist)
    # Wind columns of the source-node features are D-3 / D-2 (== x[..., -3:-1]).
    speed = feat[:, d - 3:d - 2] * wind_ref[2] + wind_ref[0]   # (TB*E, 1)
    direc = feat[:, d - 2:d - 1] * wind_ref[3] + wind_ref[1]   # (TB*E, 1)
    dist = ea[:, 0:1]
    cdir = ea[:, 1:2]
    theta = jnp.abs(cdir - direc)
    edge_w = jnp.maximum(3.0 * speed * jnp.cos(theta) / dist, 0.0)   # (TB*E, 1)

    # --- edge MLP layer 1: one fused K=2*D+2 MXU push + edge_w rank-1 term + bias
    z1 = (
        jnp.dot(feat, w1_ref[0:f1, :], preferred_element_type=jnp.float32)
        + edge_w * w1_ref[f1:f1 + 1, :]
        + w1_ref[f1 + 1:f1 + 2, :]
    )
    h1 = jax.nn.sigmoid(z1)                # (TB*E, E_H)

    # --- edge MLP layer 2
    h2 = jax.nn.sigmoid(
        jnp.dot(h1, w2_ref[0:e_h, :], preferred_element_type=jnp.float32)
        + w2_ref[e_h:e_h + 1, :]
    )                                      # (TB*E, E_OUT)

    # --- scatter_add(out, tgt) + scatter_add(-out, src) as a batched MXU matmul:
    #     agg[b,n,c] = sum_e (onehot_tgt - onehot_src)[n,e] * h2[b,e,c]
    h2b = h2.reshape(tb, n_edges, e_out)
    agg = jnp.einsum("bne,bec->bnc", scat_ref[...], h2b,
                     preferred_element_type=jnp.float32)             # (TB, N, E_OUT)

    # --- node MLP
    aggf = agg.reshape(tb * n_nodes, e_out)
    o = jax.nn.sigmoid(
        jnp.dot(aggf, w3_ref[0:e_out, :], preferred_element_type=jnp.float32)
        + w3_ref[e_out:e_out + 1, :]
    )                                      # (TB*N, N_OUT)
    # N_OUT=2 makes this a masked (2/128-lane) store; output bytes are tiny so a
    # fully lane-dense flatten is not worth the in-kernel relayout risk here.
    o_ref[...] = o.reshape(tb, n_nodes, n_out).astype(o_ref.dtype)


def init_params(key, in_dim=IN_DIM):
    """Deterministic synthetic parameters (shapes match the PyTorch __init__)."""
    feat_dim = in_dim * 2 + 2 + 1          # 15
    ks = jax.random.split(key, 6)
    # Stored as (in, out) so the kernel does x @ W + b (same math as nn.Linear).
    w1 = jax.random.uniform(ks[0], (feat_dim, E_H), jnp.float32, -0.3, 0.3)
    b1 = jax.random.uniform(ks[1], (1, E_H), jnp.float32, -0.3, 0.3)
    w2 = jax.random.uniform(ks[2], (E_H, E_OUT), jnp.float32, -0.3, 0.3)
    b2 = jax.random.uniform(ks[3], (1, E_OUT), jnp.float32, -0.3, 0.3)
    w3 = jax.random.uniform(ks[4], (E_OUT, N_OUT), jnp.float32, -0.3, 0.3)
    b3 = jax.random.uniform(ks[5], (1, N_OUT), jnp.float32, -0.3, 0.3)
    # NOTE: self.w / self.b of the PyTorch module are unused in forward().
    return dict(w1=w1, b1=b1, w2=w2, b2=b2, w3=w3, b3=b3)


@functools.partial(jax.jit, static_argnames=("tb",))
def graph_gnn_forward(x, edge_index, edge_attr, wind_mean, wind_std, params, *, tb=64):
    B, N, D = x.shape
    E = edge_index.shape[1]
    F1 = 2 * D + 2
    edge_src = edge_index[0]
    edge_tgt = edge_index[1]

    # Batch tile: TB batch elements per grid step. Pad B up to a multiple of TB;
    # padded rows are sliced off at the end (zero features are numerically safe:
    # dist > 0, so no inf/NaN).
    TB = max(1, min(tb, B))
    G = pl.cdiv(B, TB)
    B_pad = G * TB

    # Glue: gather endpoint features, normalize edge attrs, build scatter tensor.
    # TODO(synk): for production graphs (E >> N) move this gather onto the MXU
    # inside the kernel (one-hot gather matrices) to cut HBM traffic to ~N*D.
    x_src = jnp.take(x, edge_src, axis=1)                      # (B, E, D)
    x_tgt = jnp.take(x, edge_tgt, axis=1)                      # (B, E, D)
    ea = edge_attr.astype(jnp.float32)
    ea_norm = (ea - ea.mean(axis=0)) / ea.std(axis=0, ddof=1)  # torch unbiased std
    feat = jnp.concatenate(
        [x_src, x_tgt, jnp.broadcast_to(ea_norm[None], (B, E, 2))], axis=-1
    ).astype(jnp.float32)                                      # (B, E, F1)
    if B_pad != B:
        feat = jnp.pad(feat, ((0, B_pad - B), (0, 0), (0, 0)))
    feat = feat.reshape(G, TB * E, F1)                         # flat (batch, edge) rows

    ea_tiled = jnp.tile(ea, (TB, 1))                           # (TB*E, 2)

    scat = (jax.nn.one_hot(edge_tgt, N, dtype=jnp.float32)
            - jax.nn.one_hot(edge_src, N, dtype=jnp.float32)).T            # (N, E)
    scat_b = jnp.broadcast_to(scat[None], (TB, N, E))

    # Pack constant weights/biases into three slabs (fewer BlockSpec pipelines).
    w1_pack = jnp.concatenate([params["w1"], params["b1"]], axis=0)        # (F1+2, E_H)
    w2_pack = jnp.concatenate([params["w2"], params["b2"]], axis=0)        # (E_H+1, E_OUT)
    w3_pack = jnp.concatenate([params["w3"], params["b3"]], axis=0)        # (E_OUT+1, N_OUT)
    wind = jnp.concatenate([wind_mean, wind_std]).astype(jnp.float32)      # (4,)

    bcast = lambda shape: pl.BlockSpec(shape, lambda g: tuple(0 for _ in shape))

    out = pl.pallas_call(
        _graph_gnn_kernel,
        grid=(G,),
        in_specs=[
            pl.BlockSpec(memory_space=pltpu.SMEM),                   # wind (4,)
            pl.BlockSpec((1, TB * E, F1), lambda g: (g, 0, 0)),      # feat
            bcast((TB * E, 2)),                                      # ea_tiled
            bcast((TB, N, E)),                                       # scat_b
            bcast((F1 + 2, E_H)),                                    # w1_pack
            bcast((E_H + 1, E_OUT)),                                 # w2_pack
            bcast((E_OUT + 1, N_OUT)),                               # w3_pack
        ],
        out_specs=pl.BlockSpec((TB, N, N_OUT), lambda g: (g, 0, 0)),
        out_shape=jax.ShapeDtypeStruct((B_pad, N, N_OUT), jnp.float32),
        compiler_params=pltpu.CompilerParams(
            dimension_semantics=("parallel",)),   # batch tiles are independent; use both v7x TCs
    )(wind, feat, ea_tiled, scat_b, w1_pack, w2_pack, w3_pack)
    return out[:B]


def graph_gnn_reference(x, edge_index, edge_attr, wind_mean, wind_std, params):
    """Pure-JAX reference mirroring the PyTorch forward, for verification."""
    B, N, D = x.shape
    edge_src, edge_tgt = edge_index[0], edge_index[1]
    node_src = x[:, edge_src]
    node_tgt = x[:, edge_tgt]
    src_wind = node_src[:, :, -3:-1] * wind_std[None, None, :] + wind_mean[None, None, :]
    speed, direc = src_wind[:, :, 0], src_wind[:, :, 1]
    ea = jnp.broadcast_to(edge_attr[None], (B,) + edge_attr.shape)
    dist, cdir = ea[:, :, 0], ea[:, :, 1]
    theta = jnp.abs(cdir - direc)
    ew = jax.nn.relu(3.0 * speed * jnp.cos(theta) / dist)
    ean = (edge_attr - edge_attr.mean(0)) / edge_attr.std(0, ddof=1)
    ean = jnp.broadcast_to(ean[None], (B,) + ean.shape)
    out = jnp.concatenate([node_src, node_tgt, ean, ew[:, :, None]], axis=-1)
    out = jax.nn.sigmoid(out @ params["w1"] + params["b1"])
    out = jax.nn.sigmoid(out @ params["w2"] + params["b2"])
    out_add = jax.ops.segment_sum(out.swapaxes(0, 1), edge_tgt, num_segments=N).swapaxes(0, 1)
    out_sub = jax.ops.segment_sum((-out).swapaxes(0, 1), edge_src, num_segments=N).swapaxes(0, 1)
    out = out_add + out_sub
    return jax.nn.sigmoid(out @ params["w3"] + params["b3"])


if __name__ == "__main__":
    key = jax.random.PRNGKey(0)
    k_x, k_ei, k_ea, k_p = jax.random.split(key, 4)

    B, N, E = 8, 8, 16                                     # small demo sizes
    x = jax.random.normal(k_x, (B, N, IN_DIM), jnp.float32)
    edge_index = jax.random.randint(k_ei, (2, E), 0, N, dtype=jnp.int32)
    dist = jax.random.uniform(k_ea, (E, 1), jnp.float32, 1.0, 5.0)
    direc = jax.random.uniform(jax.random.fold_in(k_ea, 1), (E, 1), jnp.float32, 0.0, 360.0)
    edge_attr = jnp.concatenate([dist, direc], axis=-1)    # (E, 2)
    wind_mean = jnp.array([2.0, 180.0], jnp.float32)
    wind_std = jnp.array([1.0, 90.0], jnp.float32)

    params = init_params(k_p)

    # tb=4 -> two batch tiles -> grid=(2,) so the batch-tiled pipeline is exercised.
    out = graph_gnn_forward(x, edge_index, edge_attr, wind_mean, wind_std, params, tb=4)
    out = jax.block_until_ready(out)

    ref = graph_gnn_reference(x, edge_index, edge_attr, wind_mean, wind_std, params)
    assert out.shape == (B, N, N_OUT)
    assert jnp.allclose(out, ref, atol=2e-4), float(jnp.abs(out - ref).max())

    print("KERNEL_OK")
</pallas_src>

<mosaic_0001>
module attributes {stable_mosaic.version = 11 : i64} {
  func.func @_graph_gnn_kernel(%arg0: i32, %arg1: memref<4xf32, #tpu.memory_space<smem>>, %arg2: memref<1x64x14xf32, #tpu.memory_space<vmem>>, %arg3: memref<64x2xf32, #tpu.memory_space<vmem>>, %arg4: memref<4x8x16xf32, #tpu.memory_space<vmem>>, %arg5: memref<16x27xf32, #tpu.memory_space<vmem>>, %arg6: memref<28x27xf32, #tpu.memory_space<vmem>>, %arg7: memref<28x2xf32, #tpu.memory_space<vmem>>, %arg8: memref<4x8x2xf32, #tpu.memory_space<vmem>>) attributes {dimension_semantics = [#tpu.dimension_semantics<parallel>], iteration_bounds = array<i64: 2>, scalar_prefetch = 0 : i64, scratch_operands = 0 : i64, tpu.core_type = #tpu.core_type<tc>, window_params = [{transform_indices = @transform_0, window_bounds = array<i64: 4>}, {transform_indices = @transform_1, window_bounds = array<i64: 1, 64, 14>}, {pipeline_mode = #tpu.pipeline_mode<synchronous>, transform_indices = @transform_2, window_bounds = array<i64: 64, 2>}, {pipeline_mode = #tpu.pipeline_mode<synchronous>, transform_indices = @transform_3, window_bounds = array<i64: 4, 8, 16>}, {pipeline_mode = #tpu.pipeline_mode<synchronous>, transform_indices = @transform_4, window_bounds = array<i64: 16, 27>}, {pipeline_mode = #tpu.pipeline_mode<synchronous>, transform_indices = @transform_5, window_bounds = array<i64: 28, 27>}, {pipeline_mode = #tpu.pipeline_mode<synchronous>, transform_indices = @transform_6, window_bounds = array<i64: 28, 2>}, {transform_indices = @transform_7, window_bounds = array<i64: 4, 8, 2>}]} {
    %c0 = arith.constant 0 : index
    %c0_0 = arith.constant 0 : index
    %c0_1 = arith.constant 0 : index
    %0 = vector.load %arg2[%c0, %c0_0, %c0_1] : memref<1x64x14xf32, #tpu.memory_space<vmem>>, vector<1x64x14xf32>
    %1 = vector.shape_cast %0 : vector<1x64x14xf32> to vector<64x14xf32>
    %c0_2 = arith.constant 0 : index
    %c0_3 = arith.constant 0 : index
    %2 = vector.load %arg3[%c0_2, %c0_3] : memref<64x2xf32, #tpu.memory_space<vmem>>, vector<64x2xf32>
    %3 = vector.extract_strided_slice %1 {offsets = [0, 3], sizes = [64, 1], strides = [1, 1]} : vector<64x14xf32> to vector<64x1xf32>
    %c2 = arith.constant 2 : index
    %4 = memref.load %arg1[%c2] : memref<4xf32, #tpu.memory_space<smem>>
    %5 = vector.broadcast %4 : f32 to vector<64x1xf32>
    %6 = arith.mulf %3, %5 : vector<64x1xf32>
    %c0_4 = arith.constant 0 : index
    %7 = memref.load %arg1[%c0_4] : memref<4xf32, #tpu.memory_space<smem>>
    %8 = vector.broadcast %7 : f32 to vector<64x1xf32>
    %9 = arith.addf %6, %8 : vector<64x1xf32>
    %10 = vector.extract_strided_slice %1 {offsets = [0, 4], sizes = [64, 1], strides = [1, 1]} : vector<64x14xf32> to vector<64x1xf32>
    %c3 = arith.constant 3 : index
    %11 = memref.load %arg1[%c3] : memref<4xf32, #tpu.memory_space<smem>>
    %12 = vector.broadcast %11 : f32 to vector<64x1xf32>
    %13 = arith.mulf %10, %12 : vector<64x1xf32>
    %c1 = arith.constant 1 : index
    %14 = memref.load %arg1[%c1] : memref<4xf32, #tpu.memory_space<smem>>
    %15 = vector.broadcast %14 : f32 to vector<64x1xf32>
    %16 = arith.addf %13, %15 : vector<64x1xf32>
    %17 = vector.extract_strided_slice %2 {offsets = [0, 0], sizes = [64, 1], strides = [1, 1]} : vector<64x2xf32> to vector<64x1xf32>
    %18 = vector.extract_strided_slice %2 {offsets = [0, 1], sizes = [64, 1], strides = [1, 1]} : vector<64x2xf32> to vector<64x1xf32>
    %19 = arith.subf %18, %16 : vector<64x1xf32>
    %20 = math.absf %19 : vector<64x1xf32>
    %cst = arith.constant 3.000000e+00 : f32
    %21 = vector.broadcast %cst : f32 to vector<64x1xf32>
    %22 = arith.mulf %21, %9 : vector<64x1xf32>
    %23 = math.cos %20 : vector<64x1xf32>
    %24 = arith.mulf %22, %23 : vector<64x1xf32>
    %25 = arith.divf %24, %17 : vector<64x1xf32>
    %cst_5 = arith.constant 0.000000e+00 : f32
    %26 = vector.broadcast %cst_5 : f32 to vector<64x1xf32>
    %27 = arith.maximumf %25, %26 : vector<64x1xf32>
    %c0_6 = arith.constant 0 : index
    %c0_7 = arith.constant 0 : index
    %28 = vector.load %arg5[%c0_6, %c0_7] : memref<16x27xf32, #tpu.memory_space<vmem>>, vector<14x27xf32>
    %cst_8 = arith.constant dense<0.000000e+00> : vector<64x27xf32>
    %29 = tpu.matmul %1, %28, %cst_8 {dimension_numbers = #tpu.dot_dimension_numbers<[1], [0], [0], [1], [0, 0, 1, 1], [], []>} : vector<64x14xf32>, vector<14x27xf32>, vector<64x27xf32> -> vector<64x27xf32>
    %c14 = arith.constant 14 : index
    %c0_9 = arith.constant 0 : index
    %30 = vector.load %arg5[%c14, %c0_9] : memref<16x27xf32, #tpu.memory_space<vmem>>, vector<1x27xf32>
    %31 = vector.broadcast %27 : vector<64x1xf32> to vector<64x27xf32>
    %32 = vector.broadcast %30 : vector<1x27xf32> to vector<64x27xf32>
    %33 = arith.mulf %31, %32 : vector<64x27xf32>
    %34 = arith.addf %29, %33 : vector<64x27xf32>
    %c15 = arith.constant 15 : index
    %c0_10 = arith.constant 0 : index
    %35 = vector.load %arg5[%c15, %c0_10] : memref<16x27xf32, #tpu.memory_space<vmem>>, vector<1x27xf32>
    %36 = vector.broadcast %35 : vector<1x27xf32> to vector<64x27xf32>
    %37 = arith.addf %34, %36 : vector<64x27xf32>
    %38 = arith.negf %37 : vector<64x27xf32>
    %39 = math.exp %38 : vector<64x27xf32>
    %cst_11 = arith.constant 1.000000e+00 : f32
    %40 = vector.broadcast %cst_11 : f32 to vector<64x27xf32>
    %41 = arith.addf %40, %39 : vector<64x27xf32>
    %42 = arith.divf %40, %41 : vector<64x27xf32>
    %c0_12 = arith.constant 0 : index
    %c0_13 = arith.constant 0 : index
    %43 = vector.load %arg6[%c0_12, %c0_13] : memref<28x27xf32, #tpu.memory_space<vmem>>, vector<27x27xf32>
    %cst_14 = arith.constant dense<0.000000e+00> : vector<64x27xf32>
    %44 = tpu.matmul %42, %43, %cst_14 {dimension_numbers = #tpu.dot_dimension_numbers<[1], [0], [0], [1], [0, 0, 1, 1], [], []>} : vector<64x27xf32>, vector<27x27xf32>, vector<64x27xf32> -> vector<64x27xf32>
    %c27 = arith.constant 27 : index
    %c0_15 = arith.constant 0 : index
    %45 = vector.load %arg6[%c27, %c0_15] : memref<28x27xf32, #tpu.memory_space<vmem>>, vector<1x27xf32>
    %46 = vector.broadcast %45 : vector<1x27xf32> to vector<64x27xf32>
    %47 = arith.addf %44, %46 : vector<64x27xf32>
    %48 = arith.negf %47 : vector<64x27xf32>
    %49 = math.exp %48 : vector<64x27xf32>
    %cst_16 = arith.constant 1.000000e+00 : f32
    %50 = vector.broadcast %cst_16 : f32 to vector<64x27xf32>
    %51 = arith.addf %50, %49 : vector<64x27xf32>
    %52 = arith.divf %50, %51 : vector<64x27xf32>
    %53 = vector.shape_cast %52 : vector<64x27xf32> to vector<4x16x27xf32>
    %c0_17 = arith.constant 0 : index
    %c0_18 = arith.constant 0 : index
    %c0_19 = arith.constant 0 : index
    %54 = vector.load %arg4[%c0_17, %c0_18, %c0_19] : memref<4x8x16xf32, #tpu.memory_space<vmem>>, vector<4x8x16xf32>
    "tpu.trace_start"() <{level = 10 : i32, message = "bne,bec->bnc"}> : () -> ()
    %cst_20 = arith.constant dense<0.000000e+00> : vector<4x8x27xf32>
    %55 = tpu.matmul %54, %53, %cst_20 {dimension_numbers = #tpu.dot_dimension_numbers<[2], [1], [1], [2], [0, 0, 0, 1, 1, 2], [0], [0]>} : vector<4x8x16xf32>, vector<4x16x27xf32>, vector<4x8x27xf32> -> vector<4x8x27xf32>
    "tpu.trace_stop"() : () -> ()
    %56 = vector.shape_cast %55 : vector<4x8x27xf32> to vector<32x27xf32>
    %c0_21 = arith.constant 0 : index
    %c0_22 = arith.constant 0 : index
    %57 = vector.load %arg7[%c0_21, %c0_22] : memref<28x2xf32, #tpu.memory_space<vmem>>, vector<27x2xf32>
    %cst_23 = arith.constant dense<0.000000e+00> : vector<32x2xf32>
    %58 = tpu.matmul %56, %57, %cst_23 {dimension_numbers = #tpu.dot_dimension_numbers<[1], [0], [0], [1], [0, 0, 1, 1], [], []>} : vector<32x27xf32>, vector<27x2xf32>, vector<32x2xf32> -> vector<32x2xf32>
    %c27_24 = arith.constant 27 : index
    %c0_25 = arith.constant 0 : index
    %59 = vector.load %arg7[%c27_24, %c0_25] : memref<28x2xf32, #tpu.memory_space<vmem>>, vector<1x2xf32>
    %60 = vector.broadcast %59 : vector<1x2xf32> to vector<32x2xf32>
    %61 = arith.addf %58, %60 : vector<32x2xf32>
    %62 = arith.negf %61 : vector<32x2xf32>
    %63 = math.exp %62 : vector<32x2xf32>
    %cst_26 = arith.constant 1.000000e+00 : f32
    %64 = vector.broadcast %cst_26 : f32 to vector<32x2xf32>
    %65 = arith.addf %64, %63 : vector<32x2xf32>
    %66 = arith.divf %64, %65 : vector<32x2xf32>
    %67 = vector.shape_cast %66 : vector<32x2xf32> to vector<4x8x2xf32>
    %c0_27 = arith.constant 0 : index
    %c0_28 = arith.constant 0 : index
    %c0_29 = arith.constant 0 : index
    %68 = vector.load %arg8[%c0_27, %c0_28, %c0_29] : memref<4x8x2xf32, #tpu.memory_space<vmem>>, vector<4x8x2xf32>
    tpu.vector_store %arg8[%c0_27, %c0_28, %c0_29], %67 {strides = array<i32>} : memref<4x8x2xf32, #tpu.memory_space<vmem>>, vector<4x8x2xf32>,
    return
  }
  func.func @transform_0(%arg0: i32) -> i32 {
    %c0_i32 = arith.constant 0 : i32
    %c0_i32_0 = arith.constant 0 : i32
    return %c0_i32 : i32
  }
  func.func @transform_1(%arg0: i32) -> (i32, i32, i32) {
    %c0_i32 = arith.constant 0 : i32
    %c0_i32_0 = arith.constant 0 : i32
    %c0_i32_1 = arith.constant 0 : i32
    return %arg0, %c0_i32, %c0_i32_0 : i32, i32, i32
  }
  func.func @transform_2(%arg0: i32) -> (i32, i32) {
    %c0_i32 = arith.constant 0 : i32
    %c0_i32_0 = arith.constant 0 : i32
    %c0_i32_1 = arith.constant 0 : i32
    return %c0_i32, %c0_i32_0 : i32, i32
  }
  func.func @transform_3(%arg0: i32) -> (i32, i32, i32) {
    %c0_i32 = arith.constant 0 : i32
    %c0_i32_0 = arith.constant 0 : i32
    %c0_i32_1 = arith.constant 0 : i32
    %c0_i32_2 = arith.constant 0 : i32
    return %c0_i32, %c0_i32_0, %c0_i32_1 : i32, i32, i32
  }
  func.func @transform_4(%arg0: i32) -> (i32, i32) {
    %c0_i32 = arith.constant 0 : i32
    %c0_i32_0 = arith.constant 0 : i32
    %c0_i32_1 = arith.constant 0 : i32
    return %c0_i32, %c0_i32_0 : i32, i32
  }
  func.func @transform_5(%arg0: i32) -> (i32, i32) {
    %c0_i32 = arith.constant 0 : i32
    %c0_i32_0 = arith.constant 0 : i32
    %c0_i32_1 = arith.constant 0 : i32
    return %c0_i32, %c0_i32_0 : i32, i32
  }
  func.func @transform_6(%arg0: i32) -> (i32, i32) {
    %c0_i32 = arith.constant 0 : i32
    %c0_i32_0 = arith.constant 0 : i32
    %c0_i32_1 = arith.constant 0 : i32
    return %c0_i32, %c0_i32_0 : i32, i32
  }
  func.func @transform_7(%arg0: i32) -> (i32, i32, i32) {
    %c0_i32 = arith.constant 0 : i32
    %c0_i32_0 = arith.constant 0 : i32
    %c0_i32_1 = arith.constant 0 : i32
    return %arg0, %c0_i32, %c0_i32_0 : i32, i32, i32
  }
}

</mosaic_0001>

<bundles_post_ra>
// kernel: graph_gnn_forward.1
= control target key start
LH: loop header
LB: loop body
LE: loop exit
PB: predicated region body
PF: predicated region fallthrough
CT: control target
= control target key end

     0   :  { %12 = vsyncpa [#allocation3], 0  ;;  %s2793_s24 = smov 0   ;;  %s3851_s0 = inlined_call_operand.vmem [shape: f32[4], index: 0, kind: input, shape index: {}]   ;;  %s3852_s1 = inlined_call_operand.vmem [shape: f32[2,64,14], index: 1, kind: input, shape index: {}]   ;;  %s3853_s2 = inlined_call_operand.vmem [shape: f32[64,2], index: 2, kind: input, shape index: {}]   ;;  %s3854_s3 = inlined_call_operand.vmem [shape: f32[4,8,16], index: 3, kind: input, shape index: {}]   ;;  %s3855_s4 = inlined_call_operand.vmem [shape: f32[16,27], index: 4, kind: input, shape index: {}]   ;;  %s3856_s5 = inlined_call_operand.vmem [shape: f32[28,27], index: 5, kind: input, shape index: {}]   ;;  %s3857_s6 = inlined_call_operand.vmem [shape: f32[28,2], index: 6, kind: input, shape index: {}]   ;;  %s3858_s7 = inlined_call_operand.vmem [shape: f32[8,8,2], index: 7, kind: output, shape index: {}]  }
   0x1 LB: > { %s2799_s25 = sadd.s32 4294967295, %s2736_s24   ;;  %p2248_p0 = scmp.ge.s32.totalorder %s2736_s24, 1  ;;  %s2736_s24 = sphi %s2793_s24, %s18_s24  }
   0x2   : > { %p201_p1 = scmp.lt.s32.totalorder %s2736_s24, 3  ;;  %s214_s28 = sshll.u32 %s3851_s0, 4  ;;  %s215_s28 = int_to_ptr.vmem [resolvable:$true] %s214_s28 }
   0x3   : > { %p2548_p3 = scmp.eq.s32.totalorder %s2799_s25, 0  ;;  %s2711_s30 = scalar_lea.vmem %s215_s28, 16 }
   0x4   : > { %p2806_p2 = pnand %p2248_p0, %p201_p1  ;;  %p2712_p6 = scmp.ne.s32.totalorder %s215_s28, %s2711_s30 }
   0x5   : > { %p2719_p10 = scmp.lt.s32.totalorder %s215_s28, %s215_s28  ;;  %p2720_p11 = scmp.lt.s32.totalorder %s2711_s30, %s2711_s30 }
   0x6   : > { %p2544_p4 = pneg %p2806_p2 }
   0x7   : > { %p2721_p12 = por %p2720_p11, %p2719_p10 }
   0x8   : > { %p2545_p5 = pnand %p2548_p3, %p2544_p4 }
   0xa   : > { %p2713_p7 = pneg %p2545_p5 }
   0xc   : > { %p2714_p8 = pnand %p2713_p7, %p2712_p6 }
   0xe   : > { %p2715_p9 = pneg %p2714_p8 }
  0x10   : > { %p2722_p13 = pnand %p2721_p12, %p2715_p9 }
  0x12   : > { %2725 = shalt.err (!%p2722_p13)
}
  0x13   : > { %s2738_s8 = smov [#allocation2]   ;;  %250 = sbr.rel (%p2806_p2) target bundleno = 1362 (0x552), region = 48 }
  0x14   : > { %2547 = dma.vmem_to_smem (!%p2545_p5), %s215_s28, 16, %s2738_s8, [#allocation3]  }
  0x1a   : > { %2731 = dma.done.wait (%p2548_p3), [#allocation3], 16  }
  0x1b   : > { %2733 = vsyncadd (%p2548_p3), [#allocation3], 4294967280 }
  0x1c   : > { %256 = sfence }
  0x1d   : > { %p283_p0 = scmp.lt.s32.totalorder %s2799_s25, 1  ;;  %s2258_s9 = sld [smem:[#allocation2 + $0x3]]  ;;  %v302_v26 = vld [vmem:[%s3853_s2] sm:$0xff]  ;;  %v304_v27 = vld [vmem:[%s3853_s2 + $0x10] sm:$0xff]  ;;  %v303_v28 = vld [vmem:[%s3853_s2 + $0x8] sm:$0xff] }
  0x1e   : > { %s2259_s10 = sld [smem:[#allocation2 + $0x1]]  ;;  %s2739_s16 = smov 125   ;;  %v305_v29 = vld [vmem:[%s3853_s2 + $0x18] sm:$0xff]  ;;  %v307_v30 = vld [vmem:[%s3853_s2 + $0x28] sm:$0xff]  ;;  %v306_v31 = vld [vmem:[%s3853_s2 + $0x20] sm:$0xff] }
  0x1f   : > { %s284_s11 = scalar_select %p283_p0, %s2799_s25, 1  ;;  %v2857_v32 = vld [vmem:[%s3853_s2 + $0x38] sm:$0xff]  ;;  %v2862_v33 = vld [vmem:[%s3853_s2 + $0x30] sm:$0xff] }
  0x20   : > { %s2740_s21 = smov 3   ;;  %s2747_s13 = smov 2  }
  0x21   : > { %s2345_s12 = sshll.u32 %s284_s11, 6  ;;  %s3631_s19 = sld [smem:[#allocation2 + $0x2]] }
  0x22   : > { %s2826_s15 = scalar_lea.vmem %s3852_s1, %s2345_s12  ;;  %s3644_s20 = sld [smem:[#allocation2]] }
  0x23   : > { %v295_v0 = vld [vmem:[%s2826_s15 + $0x8] sm:$0xff]  ;;  %v331_v1 = vstv %s2258_s9  ;;  %v294_v2 = vld [vmem:[%s2826_s15] sm:$0xff]  ;;  %v297_v3 = vld [vmem:[%s2826_s15 + $0x18] sm:$0xff] }
  0x24   : > { %v333_v4 = vmul.f32 %v331_v1, %v295_v0  ;;  %v341_v5 = vstv %s2259_s10  ;;  %v332_v6 = vmul.f32 %v331_v1, %v294_v2  ;;  %v335_v7 = vmul.f32 %v331_v1, %v297_v3  ;;  %v296_v8 = vld [vmem:[%s2826_s15 + $0x10] sm:$0xff]  ;;  %v299_v9 = vld [vmem:[%s2826_s15 + $0x28] sm:$0xff]  ;;  %v298_v11 = vld [vmem:[%s2826_s15 + $0x20] sm:$0xff]  ;;  %s2255_s10 = sshll.u32 %s2799_s25, 2 }
  0x25   : > { %v334_v10 = vmul.f32 %v331_v1, %v296_v8  ;;  %v337_v14 = vmul.f32 %v331_v1, %v299_v9  ;;  %v336_v17 = vmul.f32 %v331_v1, %v298_v11  ;;  %v301_v18 = vld [vmem:[%s2826_s15 + $0x38] sm:$0xff]  ;;  %v300_v19 = vld [vmem:[%s2826_s15 + $0x30] sm:$0xff]  ;;  %p289_p1 = scmp.lt.s32.totalorder %s2255_s10, 7 }
  0x26   : > { %v343_v12 = vadd.f32 %v341_v5, %v333_v4  ;;  %v342_v13 = vadd.f32 %v341_v5, %v332_v6  ;;  %v345_v15 = vadd.f32 %v341_v5, %v335_v7  ;;  %v339_v20 = vmul.f32 %v331_v1, %v301_v18 }
  0x27   : > { %v344_v16 = vadd.f32 %v341_v5, %v334_v10  ;;  %v347_v21 = vadd.f32 %v341_v5, %v337_v14  ;;  %v346_v22 = vadd.f32 %v341_v5, %v336_v17  ;;  %v338_v23 = vmul.f32 %v331_v1, %v300_v19  ;;  %s3863_s10 = smov (!%p289_p1, %s2255_s10), 7 }
  0x28   : > { %360 = vrot.lane.b32.xlu1 %v343_v12, %s2739_s16  ;;  %358 = vrot.lane.b32.xlu0 %v342_v13, %s2739_s16  ;;  %v349_v24 = vadd.f32 %v341_v5, %v339_v20  ;;  %s2256_s11 = sshll.u32 %s3863_s10, 3 }
  0x29   : > { %v348_v25 = vadd.f32 %v341_v5, %v338_v23  ;;  %s292_s14 = scalar_lea.vmem %s3858_s7, %s2256_s11 }
  0x2c   : > { %364 = vrot.lane.b32.xlu1 %v345_v15, %s2739_s16  ;;  %362 = vrot.lane.b32.xlu0 %v344_v16, %s2739_s16 }
  0x30   : > { %368 = vrot.lane.b32.xlu1 %v347_v21, %s2739_s16  ;;  %366 = vrot.lane.b32.xlu0 %v346_v22, %s2739_s16 }
  0x34   : > { %372 = vrot.lane.b32.xlu1 %v349_v24, %s2739_s16  ;;  %370 = vrot.lane.b32.xlu0 %v348_v25, %s2739_s16 }
  0x38   : > { %1258 = vrot.lane.b32.xlu1 %v304_v27, %s2740_s21  ;;  %1254 = vrot.lane.b32.xlu0 %v302_v26, %s2740_s21 }
  0x3c   : > { %1260 = vrot.lane.b32.xlu1 %v305_v29, %s2740_s21  ;;  %1256 = vrot.lane.b32.xlu0 %v303_v28, %s2740_s21 }
  0x40   : > { %1264 = vrot.lane.b32.xlu1 %v307_v30, %s2740_s21  ;;  %1262 = vrot.lane.b32.xlu0 %v306_v31, %s2740_s21 }
  0x44   : > { %1268 = vrot.lane.b32.xlu1 %v2857_v32, %s2740_s21  ;;  %1266 = vrot.lane.b32.xlu0 %v2862_v33, %s2740_s21 }
  0x9a   : > { %v361_v34 = vpop.permute.xlu1 %360  ;;  %v359_v35 = vpop.permute.xlu0 %358 }
  0x9b   : > { %v383_v36 = vsub.f32 %v303_v28, %v361_v34  ;;  %v382_v37 = vsub.f32 %v302_v26, %v359_v35 }
  0x9d   : > { %v2866_v38 = vand.u32 2147483647, %v383_v36  ;;  %v2868_v39 = vand.u32 2147483647, %v382_v37 }
  0x9e   : > { %v365_v40 = vpop.permute.xlu1 %364  ;;  %v363_v41 = vpop.permute.xlu0 %362 }
  0x9f   : > { %v508_v42 = vand.u32 2139095040, %v2866_v38  ;;  %v408_v43 = vand.u32 2139095040, %v2868_v39  ;;  %v385_v44 = vsub.f32 %v305_v29, %v365_v40  ;;  %v384_v45 = vsub.f32 %v304_v27, %v363_v41 }
  0xa0   : > { %v512_v4 = vand.u32 8388607, %v2866_v38  ;;  %v412_v6 = vand.u32 8388607, %v2868_v39 }
  0xa1   : > { %v509_v46 = vshrl.u32 %v508_v42, 23  ;;  %v409_v47 = vshrl.u32 %v408_v43, 23  ;;  %v2872_v48 = vand.u32 2147483647, %v385_v44  ;;  %v2874_v49 = vand.u32 2147483647, %v384_v45 }
  0xa2   : > { %v369_v50 = vpop.permute.xlu1 %368  ;;  %v367_v51 = vpop.permute.xlu0 %366  ;;  %v513_v13 = vor.u32 8388608, %v512_v4  ;;  %v413_v16 = vor.u32 8388608, %v412_v6  ;;  %v2741_v43 = vmov 2475754826  }
  0xa3   : > { %v2260_v52 = vadd.s32 4294967169, %v409_v47  ;;  %v2264_v53 = vadd.s32 4294967169, %v509_v46  ;;  %v708_v54 = vand.u32 2139095040, %v2872_v48  ;;  %v608_v55 = vand.u32 2139095040, %v2874_v49 }
  0xa4   : > { %v387_v57 = vsub.f32 %v307_v30, %v369_v50  ;;  %v386_v58 = vsub.f32 %v306_v31, %v367_v51  ;;  %v712_v7 = vand.u32 8388607, %v2872_v48  ;;  %v612_v9 = vand.u32 8388607, %v2874_v49 }
  0xa5   : > { %v415_v56 = vadd.s32 1, %v2260_v52  ;;  %v709_v59 = vshrl.u32 %v708_v54, 23  ;;  %v609_v60 = vshrl.u32 %v608_v55, 23  ;;  %v515_v62 = vadd.s32 1, %v2264_v53 }
  0xa6   : > { %v2878_v61 = vand.u32 2147483647, %v387_v57  ;;  %v2880_v0 = vand.u32 2147483647, %v386_v58  ;;  %v713_v17 = vor.u32 8388608, %v712_v7  ;;  %v613_v20 = vor.u32 8388608, %v612_v9  ;;  %v373_v24 = vpop.permute.xlu1 %372  ;;  %v371_v57 = vpop.permute.xlu0 %370 }
  0xa7   : > { %vm416_vm0 = vcmp.gt.s32.totalorder %v415_v56, 0  ;;  %v2272_v63 = vadd.s32 4294967169, %v709_v59  ;;  %v2268_v2 = vadd.s32 4294967169, %v609_v60  ;;  %vm516_vm1 = vcmp.gt.s32.totalorder %v515_v62, 0 }
  0xa8   : > { %v908_v3 = vand.u32 2139095040, %v2878_v61  ;;  %v417_v5 = vsel %vm416_vm0, %v415_v56, 0  ;;  %v808_v8 = vand.u32 2139095040, %v2880_v0  ;;  %v517_v14 = vsel %vm516_vm1, %v515_v62, 0 }
  0xa9   : > { %v715_v1 = vadd.s32 1, %v2272_v63  ;;  %v419_v10 = vand.u32 31, %v417_v5  ;;  %v615_v11 = vadd.s32 1, %v2268_v2  ;;  %v912_v15 = vand.u32 8388607, %v2878_v61 }
  0xaa   : > { %v909_v12 = vshrl.u32 %v908_v3, 23  ;;  %v809_v19 = vshrl.u32 %v808_v8, 23  ;;  %v2889_v21 = vand.u32 31, %v517_v14  ;;  %v812_v27 = vand.u32 8388607, %v2880_v0 }
  0xab   : > { %vm716_vm2 = vcmp.gt.s32.totalorder %v715_v1, 0  ;;  %v420_v22 = vsub.s32 32, %v419_v10  ;;  %vm616_vm3 = vcmp.gt.s32.totalorder %v615_v11, 0  ;;  %v913_v26 = vor.u32 8388608, %v912_v15 }
  0xac   : > { %v717_v18 = vsel %vm716_vm2, %v715_v1, 0  ;;  %v2280_v23 = vadd.s32 4294967169, %v909_v12  ;;  %v2894_v28 = vshll.u32 %v513_v13, 8  ;;  %v2896_v29 = vshll.u32 %v413_v16, 8 }
  0xad   : > { %v2891_v25 = vand.u32 31, %v717_v18  ;;  %v2898_v30 = vshll.u32 %v713_v17, 8  ;;  %v2276_v31 = vadd.s32 4294967169, %v809_v19  ;;  %v2900_v34 = vshrl.u32 %v517_v14, 5 }
  0xae   : > { %v2902_v35 = vshrl.u32 %v417_v5, 5  ;;  %v617_v36 = vsel %vm616_vm3, %v615_v11, 0  ;;  %v389_v37 = vsub.f32 %v2857_v32, %v373_v24  ;;  %v2906_v40 = vsub.s32 32, %v2889_v21 }
  0xaf   : > { %v2908_v41 = vshll.u32 %v613_v20, 8  ;;  %v915_v42 = vadd.s32 1, %v2280_v23  ;;  %v423_v44 = vshrl.u32 %v2741_v43, %v420_v22  ;;  %v2911_v45 = vshrl.u32 %v717_v18, 5 }
  0xb0   : > { %v2914_v46 = vsub.s32 32, %v2891_v25  ;;  %v2916_v47 = vshll.u32 %v913_v26, 8  ;;  %v813_v50 = vor.u32 8388608, %v812_v27  ;;  %v2918_v51 = vand.u32 31, %v617_v36 }
  0xb1   : > { %v815_v32 = vadd.s32 1, %v2276_v31  ;;  %v2742_v52 = vmov 683565275   ;;  %v2743_v54 = vmov 2131351028   ;;  %v425_v58 = vshll.u32 %v2741_v43, %v419_v10 }
  0xb2   : > { %v422_v53 = vshll.u32 %v2742_v52, %v419_v10  ;;  %v426_v55 = vshrl.u32 %v2743_v54, %v420_v22  ;;  %v2922_v56 = vand.u32 2147483647, %v389_v37  ;;  %v428_v59 = vshll.u32 %v2743_v54, %v419_v10 }
  0xb3   : > { %v2744_v60 = vmov 2102212464   ;;  %vm916_vm4 = vcmp.gt.s32.totalorder %v915_v42, 0  ;;  %v2745_v2 = vmov 920167782   ;;  %v2931_v9 = vshrl.u32 %v617_v36, 5 }
  0xb4   : > { %v429_v62 = vshrl.u32 %v2744_v60, %v420_v22  ;;  %v424_v63 = vor.u32 %v423_v44, %v422_v53  ;;  %v431_v1 = vshll.u32 %v2744_v60, %v419_v10  ;;  %v432_v3 = vshrl.u32 %v2745_v2, %v420_v22 }
  0xb5   : > { %v427_v4 = vor.u32 %v426_v55, %v425_v58  ;;  %v434_v6 = vshll.u32 %v2745_v2, %v419_v10  ;;  %v2746_v7 = vmov 1326507024   ;;  %v2933_v11 = vshll.u32 %v813_v50, 8 }
  0xb6   : > { %v430_v5 = vor.u32 %v429_v62, %v428_v59  ;;  %v435_v8 = vshrl.u32 %v2746_v7, %v420_v22  ;;  %v388_v12 = vsub.f32 %v2862_v33, %v371_v57  ;;  %v433_v13 = vor.u32 %v432_v3, %v431_v1 }
  0xb7   : > { %v2937_v14 = vsub.s32 32, %v2918_v51  ;;  %v917_v15 = vsel %vm916_vm4, %v915_v42, 0  ;;  %v421_v16 = vshrl.u32 %v2742_v52, %v420_v22  ;;  %vm816_vm5 = vcmp.gt.s32.totalorder %v815_v32, 0 }
  0xb8   : > { %v436_v17 = vor.u32 %v435_v8, %v434_v6  ;;  %v1108_v10 = vand.u32 2139095040, %v2922_v56  ;;  %vm437_vm6 = vcmp.lt.s32.totalorder %v2902_v35, 1  ;;  %vm440_vm7 = vcmp.lt.s32.totalorder %v2902_v35, 4 }
  0xb9   : > { %v2943_v18 = vshrl.u32 %v917_v15, 5  ;;  %v1112_v19 = vand.u32 8388607, %v2922_v56  ;;  %v442_v33 = vsel %vm440_vm7, %v430_v5, 2102212464  ;;  %v445_v20 = vsel %vm437_vm6, %v424_v63, %v427_v4 }
  0xba   : > { %vm438_vm8 = vcmp.lt.s32.totalorder %v2902_v35, 2  ;;  %vm439_vm9 = vcmp.lt.s32.totalorder %v2902_v35, 3  ;;  %v441_v23 = vsel %vm437_vm6, %v421_v16, %v424_v63  ;;  %v446_v22 = vsel %vm440_vm7, %v433_v13, 920167782 }
  0xbb   : > { %v443_v24 = vsel %vm439_vm9, %v427_v4, %v442_v33  ;;  %v447_v26 = vsel %vm439_vm9, %v430_v5, %v446_v22  ;;  %v449_v27 = vsel %vm437_vm6, %v427_v4, %v430_v5  ;;  %v450_v31 = vsel %vm440_vm7, %v436_v17, 1326507024 }
  0xbc   : > { %v2948_v36 = vand.u32 31, %v917_v15  ;;  %v817_v37 = vsel %vm816_vm5, %v815_v32, 0  ;;  %v448_v42 = vsel %vm438_vm8, %v445_v20, %v447_v26  ;;  %v451_v44 = vsel %vm439_vm9, %v433_v13, %v450_v31 }
  0xbd   : > { %v2951_v50 = vand.u32 2147483647, %v388_v12  ;;  %v452_v53 = vsel %vm438_vm8, %v449_v27, %v451_v44  ;;  %v2954_v55 = vmul.u32.u64.low %v2896_v29, %v448_v42  ;;  %v2955_v57 = vmul.u32.u64.high %v2896_v29, %v448_v42, %v2954_v55 }
  0xbe   : > { %v444_v35 = vsel %vm438_vm8, %v441_v23, %v443_v24  ;;  %v2959_v58 = vmul.u32.u64.low %v2896_v29, %v452_v53  ;;  %v2960_v59 = vmul.u32.u64.high %v2896_v29, %v452_v53, %v2959_v58  ;;  %v722_v62 = vshll.u32 %v2742_v52, %v2891_v25 }
  0xbf   : > { %v723_v32 = vshrl.u32 %v2741_v43, %v2914_v46  ;;  %v725_v63 = vshll.u32 %v2741_v43, %v2891_v25  ;;  %v726_v1 = vshrl.u32 %v2743_v54, %v2914_v46  ;;  %v728_v3 = vshll.u32 %v2743_v54, %v2891_v25 }
  0xc0   : > { %v729_v4 = vshrl.u32 %v2744_v60, %v2914_v46  ;;  %v731_v5 = vshll.u32 %v2744_v60, %v2891_v25  ;;  %v732_v6 = vshrl.u32 %v2745_v2, %v2914_v46  ;;  %v734_v8 = vshll.u32 %v2745_v2, %v2891_v25 }
  0xc1   : > { %v463_v12 = vadd.s32 1, %v2955_v57  ;;  %v724_v13 = vor.u32 %v723_v32, %v722_v62  ;;  %v727_v15 = vor.u32 %v726_v1, %v725_v63  ;;  %v735_v16 = vshrl.u32 %v2746_v7, %v2914_v46 }
  0xc2   : > { %v460_v17 = vmul.u32 %v2896_v29, %v444_v35  ;;  %vm462_vm10 = vc.u32 %v2960_v59, %v2954_v55  ;;  %v730_v33 = vor.u32 %v729_v4, %v728_v3  ;;  %v733_v20 = vor.u32 %v732_v6, %v731_v5 }
  0xc3   : > { %v464_v23 = vsel %vm462_vm10, %v463_v12, %v2955_v57  ;;  %v721_v22 = vshrl.u32 %v2742_v52, %v2914_v46  ;;  %v736_v25 = vor.u32 %v735_v16, %v734_v8  ;;  %vm737_vm11 = vcmp.lt.s32.totalorder %v2911_v45, 1 }
  0xc4   : > { %v1109_v24 = vshrl.u32 %v1108_v10, 23  ;;  %v465_v26 = vadd.s32 %v464_v23, %v460_v17  ;;  %vm739_vm12 = vcmp.lt.s32.totalorder %v2911_v45, 3  ;;  %vm740_vm13 = vcmp.lt.s32.totalorder %v2911_v45, 4 }
  0xc5   : > { %v742_v29 = vsel %vm740_vm13, %v730_v33, 2102212464  ;;  %v745_v27 = vsel %vm737_vm11, %v724_v13, %v727_v15  ;;  %v746_v31 = vsel %vm740_vm13, %v733_v20, 920167782  ;;  %v749_v42 = vsel %vm737_vm11, %v727_v15, %v730_v33 }
  0xc6   : > { %v2992_v44 = vadd.s32 536870912, %v465_v26  ;;  %vm738_vm14 = vcmp.lt.s32.totalorder %v2911_v45, 2  ;;  %v747_v53 = vsel %vm739_vm12, %v730_v33, %v746_v31  ;;  %v750_v57 = vsel %vm740_vm13, %v736_v25, 1326507024 }
  0xc7   : > { %v741_v46 = vsel %vm737_vm11, %v721_v22, %v724_v13  ;;  %v743_v35 = vsel %vm739_vm12, %v727_v15, %v742_v29  ;;  %v748_v10 = vsel %vm738_vm14, %v745_v27, %v747_v53  ;;  %v751_v58 = vsel %vm739_vm12, %v733_v20, %v750_v57 }
  0xc8   : > { %v467_v62 = vshrl.u32 %v2992_v44, 30  ;;  %v752_v32 = vsel %vm738_vm14, %v749_v42, %v751_v58  ;;  %v3001_v63 = vmul.u32.u64.low %v2898_v30, %v748_v10  ;;  %v3002_v1 = vmul.u32.u64.high %v2898_v30, %v748_v10, %v3001_v63 }
  0xc9   : > { %v3005_v3 = vshrl.u32 %v817_v37, 5  ;;  %v2288_v4 = vadd.s32 4294967169, %v1109_v24  ;;  %v3008_v5 = vmul.u32.u64.low %v2898_v30, %v752_v32  ;;  %v3009_v6 = vmul.u32.u64.high %v2898_v30, %v752_v32, %v3008_v5 }
  0xca   : > { %v3011_v8 = vand.u32 31, %v817_v37  ;;  %v3015_v12 = vor.u32 8388608, %v1112_v19  ;;  %v468_v13 = vshll.u32 %v467_v62, 30  ;;  %v744_v15 = vsel %vm738_vm14, %v741_v46, %v743_v35 }
  0xcb   : > { %v3022_v16 = vsub.s32 32, %v2948_v36  ;;  %v622_v17 = vshll.u32 %v2742_v52, %v2918_v51  ;;  %v623_v37 = vshrl.u32 %v2741_v43, %v2937_v14  ;;  %v626_v33 = vshrl.u32 %v2743_v54, %v2937_v14 }
  0xcc   : > { %v3030_v19 = vsub.s32 %v465_v26, %v468_v13  ;;  %v763_v20 = vadd.s32 1, %v3002_v1  ;;  %v625_v45 = vshll.u32 %v2741_v43, %v2918_v51  ;;  %v629_v23 = vshrl.u32 %v2744_v60, %v2937_v14 }
  0xcd   : > { %v1115_v22 = vadd.s32 1, %v2288_v4  ;;  %v1008_v25 = vand.u32 2139095040, %v2951_v50  ;;  %v760_v24 = vmul.u32 %v2898_v30, %v744_v15  ;;  %v628_v29 = vshll.u32 %v2743_v54, %v2918_v51 }
  0xce   : > { %v471_v27 = vsub.s32 0, %v3030_v19  ;;  %vm762_vm15 = vc.u32 %v3009_v6, %v3001_v63  ;;  %v624_v26 = vor.u32 %v623_v37, %v622_v17  ;;  %v627_v31 = vor.u32 %v626_v33, %v625_v45 }
  0xcf   : > { %v764_v42 = vsel %vm762_vm15, %v763_v20, %v3002_v1  ;;  %v630_v53 = vor.u32 %v629_v23, %v628_v29  ;;  %v631_v57 = vshll.u32 %v2744_v60, %v2918_v51  ;;  %v632_v46 = vshrl.u32 %v2745_v2, %v2937_v14 }
  0xd0   : > { %v2261_v30 = vmin.u32 %v471_v27, %v3030_v19  ;;  %v765_v35 = vadd.s32 %v764_v42, %v760_v24  ;;  %v634_v10 = vshll.u32 %v2745_v2, %v2918_v51  ;;  %v635_v58 = vshrl.u32 %v2746_v7, %v2937_v14 }
  0xd1   : > { %vm1116_vm0 = vcmp.gt.s32.totalorder %v1115_v22, 0  ;;  %v1009_v32 = vshrl.u32 %v1008_v25, 23  ;;  %v621_v1 = vshrl.u32 %v2742_v52, %v2937_v14  ;;  %v633_v4 = vor.u32 %v632_v46, %v631_v57 }
  0xd2   : > { %v473_v5 = vclz %v2261_v30  ;;  %v3056_v13 = vadd.s32 536870912, %v765_v35  ;;  %v636_v15 = vor.u32 %v635_v58, %v634_v10  ;;  %vm640_vm1 = vcmp.lt.s32.totalorder %v2931_v9, 4 }
  0xd3   : > { %vm637_vm2 = vcmp.lt.s32.totalorder %v2931_v9, 1  ;;  %vm639_vm3 = vcmp.lt.s32.totalorder %v2931_v9, 3  ;;  %v642_v51 = vsel %vm640_vm1, %v630_v53, 2102212464  ;;  %v646_v17 = vsel %vm640_vm1, %v633_v4, 920167782 }
  0xd4   : > { %vm407_vm4 = vcmp.le.f32.partialorder %v2868_v39, 0.7853982  ;;  %v2262_v37 = vadd.s32 4294967294, %v473_v5  ;;  %v767_v33 = vshrl.u32 %v3056_v13, 30  ;;  %v645_v20 = vsel %vm637_vm2, %v624_v26, %v627_v31 }
  0xd5   : > { %v647_v14 = vsel %vm639_vm3, %v630_v53, %v646_v17  ;;  %vm638_vm5 = vcmp.lt.s32.totalorder %v2931_v9, 2  ;;  %v641_v45 = vsel %vm637_vm2, %v621_v1, %v624_v26  ;;  %v649_v23 = vsel %vm637_vm2, %v627_v31, %v630_v53 }
  0xd6   : > { %v650_v25 = vsel %vm640_vm1, %v636_v15, 1326507024  ;;  %vm2263_vm6 = vcmp.lt.s32.totalorder %v2262_v37, 0  ;;  %v768_v24 = vshll.u32 %v767_v33, 30  ;;  %v643_v29 = vsel %vm639_vm3, %v627_v31, %v642_v51 }
  0xd7   : > { %v651_v27 = vsel %vm639_vm3, %v633_v4, %v650_v25  ;;  %v3067_v42 = vsub.s32 32, %v3011_v8  ;;  %v461_v57 = vadd.s32 %v2954_v55, %v2960_v59  ;;  %v476_v46 = vsel %vm2263_vm6, 0, %v2262_v37 }
  0xd8   : > { %v648_v30 = vsel %vm638_vm5, %v645_v20, %v647_v14  ;;  %v477_v10 = vsub.s32 32, %v476_v46  ;;  %v481_v26 = vsub.s32 4294967266, %v476_v46  ;;  %v3073_v53 = vsub.s32 %v765_v35, %v768_v24 }
  0xd9   : > { %v652_v58 = vsel %vm638_vm5, %v649_v23, %v651_v27  ;;  %v3078_v31 = vsel %vm1116_vm0, %v1115_v22, 0  ;;  %v3081_v1 = vshll.u32 %v3015_v12, 8  ;;  %v3083_v4 = vadd.s32 4294967169, %v1009_v32 }
  0xda   : > { %v644_v55 = vsel %vm638_vm5, %v641_v45, %v643_v29  ;;  %v478_v59 = vshll.u32 %v3030_v19, %v476_v46  ;;  %v479_v5 = vshrl.u32 %v461_v57, %v477_v10  ;;  %v482_v15 = vadd.s32 127, %v481_v26 }
  0xdb   : > { %v771_v35 = vsub.s32 0, %v3073_v53  ;;  %v3090_v51 = vmul.u32.u64.low %v2908_v41, %v652_v58  ;;  %v3091_v17 = vmul.u32.u64.high %v2908_v41, %v652_v58, %v3090_v51  ;;  %v3099_v12 = vand.u32 31, %v3078_v31 }
  0xdc   : > { %v3094_v22 = vmul.u32.u64.low %v2908_v41, %v648_v30  ;;  %v3095_v37 = vmul.u32.u64.high %v2908_v41, %v648_v30, %v3094_v22  ;;  %v480_v9 = vor.u32 %v479_v5, %v478_v59  ;;  %v483_v32 = vshll.u32 %v482_v15, 23 }
  0xdd   : > { %v2273_v19 = vmin.u32 %v771_v35, %v3073_v53  ;;  %v492_v20 = vsel %vm407_vm4, 0, %v467_v62  ;;  %v761_v14 = vadd.s32 %v3001_v63, %v3009_v6  ;;  %v660_v45 = vmul.u32 %v2908_v41, %v644_v55 }
  0xde   : > { %v921_v23 = vshrl.u32 %v2742_v52, %v3022_v16  ;;  %v484_v25 = vor.u32 4788187, %v483_v32  ;;  %v922_v29 = vshll.u32 %v2742_v52, %v2948_v36  ;;  %v923_v27 = vshrl.u32 %v2741_v43, %v3022_v16 }
  0xdf   : > { %v773_v24 = vclz %v2273_v19  ;;  %vm662_vm7 = vc.u32 %v3091_v17, %v3094_v22  ;;  %v663_v44 = vadd.s32 1, %v3095_v37  ;;  %v925_v62 = vshll.u32 %v2741_v43, %v2948_v36 }
  0xe0   : > { %v926_v41 = vshrl.u32 %v2743_v54, %v3022_v16  ;;  %v485_v63 = vand.u32 2147483647, %v484_v25  ;;  %v487_v6 = vcvt.s32.f32 %v480_v9  ;;  %v928_v46 = vshll.u32 %v2743_v54, %v2948_v36 }
  0xe1   : > { %v2274_v57 = vadd.s32 4294967294, %v773_v24  ;;  %v664_v30 = vsel %vm662_vm7, %v663_v44, %v3095_v37  ;;  %v929_v10 = vshrl.u32 %v2744_v60, %v3022_v16  ;;  %v931_v26 = vshll.u32 %v2744_v60, %v2948_v36 }
  0xe2   : > { %v932_v58 = vshrl.u32 %v2745_v2, %v3022_v16  ;;  %v488_v55 = vmul.f32 %v487_v6, %v485_v63  ;;  %v665_v59 = vadd.s32 %v664_v30, %v660_v45  ;;  %v924_v5 = vor.u32 %v923_v27, %v922_v29 }
  0xe3   : > { %vm2275_vm8 = vcmp.lt.s32.totalorder %v2274_v57, 0  ;;  %v927_v35 = vor.u32 %v926_v41, %v925_v62  ;;  %v934_v51 = vshll.u32 %v2745_v2, %v2948_v36  ;;  %v935_v37 = vshrl.u32 %v2746_v7, %v3022_v16 }
  0xe4   : > { %v776_v15 = vsel %vm2275_vm8, 0, %v2274_v57  ;;  %v491_v9 = vsel %vm407_vm4, %v2868_v39, %v488_v55  ;;  %v933_v25 = vor.u32 %v932_v58, %v931_v26  ;;  %v3138_v24 = vadd.s32 536870912, %v665_v59 }
  0xe5   : > { %v777_v32 = vsub.s32 32, %v776_v15  ;;  %v781_v19 = vsub.s32 4294967266, %v776_v15  ;;  %2575 = vcosq.f32 %v491_v9  ;;  %v930_v45 = vor.u32 %v929_v10, %v928_v46 }
  0xe6   : > { %vm937_vm9 = vcmp.lt.s32.totalorder %v2943_v18, 1  ;;  %2577 = vsinq.f32 %v491_v9  ;;  %v778_v29 = vshll.u32 %v3073_v53, %v776_v15  ;;  %v667_v16 = vshrl.u32 %v3138_v24, 30 }
  0xe7   : > { %v779_v36 = vshrl.u32 %v761_v14, %v777_v32  ;;  %v782_v27 = vadd.s32 127, %v781_v19  ;;  %v936_v44 = vor.u32 %v935_v37, %v934_v51  ;;  %vm939_vm10 = vcmp.lt.s32.totalorder %v2943_v18, 3 }
  0xe8   : > { %vm940_vm11 = vcmp.lt.s32.totalorder %v2943_v18, 4  ;;  %v945_v63 = vsel %vm937_vm9, %v924_v5, %v927_v35  ;;  %vm707_vm12 = vcmp.le.f32.partialorder %v2872_v48, 0.7853982  ;;  %v668_v53 = vshll.u32 %v667_v16, 30 }
  0xe9   : > { %v780_v62 = vor.u32 %v779_v36, %v778_v29  ;;  %v783_v41 = vshll.u32 %v782_v27, 23  ;;  %v946_v6 = vsel %vm940_vm11, %v933_v25, 920167782  ;;  %v942_v14 = vsel %vm940_vm11, %v930_v45, 2102212464 }
  0xea   : > { %v947_v57 = vsel %vm939_vm10, %v930_v45, %v946_v6  ;;  %v496_v46 = vand.u32 3, %v492_v20  ;;  %v792_v10 = vsel %vm707_vm12, 0, %v767_v33  ;;  %vm938_vm13 = vcmp.lt.s32.totalorder %v2943_v18, 2 }
  0xeb   : > { %v784_v30 = vor.u32 4788187, %v783_v41  ;;  %v3161_v26 = vsub.s32 %v665_v59, %v668_v53  ;;  %v948_v58 = vsel %vm938_vm13, %v945_v63, %v947_v57  ;;  %v949_v55 = vsel %vm937_vm9, %v927_v35, %v930_v45 }
  0xec   : > { %v950_v15 = vsel %vm940_vm11, %v936_v44, 1326507024  ;;  %vm495_vm14 = vweird.f32 %v2868_v39  ;;  %v787_v13 = vcvt.s32.f32 %v780_v62  ;;  %v941_v33 = vsel %vm937_vm9, %v921_v23, %v924_v5 }
  0xed   : > { %v785_v20 = vand.u32 2147483647, %v784_v30  ;;  %v943_v59 = vsel %vm939_vm10, %v927_v35, %v942_v14  ;;  %v671_v51 = vsub.s32 0, %v3161_v26  ;;  %v951_v37 = vsel %vm939_vm10, %v933_v25, %v950_v15 }
  0xee   : > { %v3178_v9 = vmul.u32.u64.low %v2916_v47, %v948_v58  ;;  %v3179_v32 = vmul.u32.u64.high %v2916_v47, %v948_v58, %v3178_v9  ;;  %v3183_v19 = vsub.s32 32, %v3099_v12  ;;  %vm497_vm15 = vcmp.lt.s32.totalorder %v496_v46, 2 }
  0xef   : > { %v788_v45 = vmul.f32 %v787_v13, %v785_v20  ;;  %v952_v23 = vsel %vm938_vm13, %v949_v55, %v951_v37  ;;  %v2576_v5 = vpop.eup %2575  ;;  %vm501_vm0 = vcmp.eq.s32.totalorder %v496_v46, 2  ;;  %v2269_v35 = vmin.u32 %v671_v51, %v3161_v26 }
  0xf0   : > { %v3189_v29 = vmul.u32.u64.low %v2916_v47, %v952_v23  ;;  %v3190_v25 = vmul.u32.u64.high %v2916_v47, %v952_v23, %v3189_v29  ;;  %v2578_v36 = vpop.eup %2577  ;;  %v502_v27 = vxor.u32 2147483648, %v2576_v5  ;;  %v3195_v62 = vand.u32 3, %v792_v10 }
  0xf1   : > { %v791_v44 = vsel %vm707_vm12, %v2872_v48, %v788_v45  ;;  %v944_v41 = vsel %vm938_vm13, %v941_v33, %v943_v59  ;;  %v499_v63 = vxor.u32 2147483648, %v2578_v36  ;;  %vm607_vm1 = vcmp.le.f32.partialorder %v2874_v49, 0.7853982 }
  0xf2   : > { %2579 = vcosq.f32 %v791_v44  ;;  %v673_v6 = vclz %v2269_v35  ;;  %v963_v53 = vadd.s32 1, %v3179_v32  ;;  %vm498_vm2 = vcmp.eq.s32.totalorder %v496_v46, 0 }
  0xf3   : > { %v503_v14 = vsel %vm501_vm0, %v502_v27, %v2578_v36  ;;  %2581 = vsinq.f32 %v791_v44  ;;  %v661_v57 = vadd.s32 %v3094_v22, %v3091_v17  ;;  %v500_v30 = vsel %vm498_vm2, %v2576_v5, %v499_v63 }
  0xf4   : > { %v2270_v10 = vadd.s32 4294967294, %v673_v6  ;;  %v960_v58 = vmul.u32 %v2916_v47, %v944_v41  ;;  %vm962_vm3 = vc.u32 %v3190_v25, %v3178_v9  ;;  %v504_v18 = vsel %vm497_vm15, %v500_v30, %v503_v14 }
  0xf5   : > { %v964_v55 = vsel %vm962_vm3, %v963_v53, %v3179_v32  ;;  %v522_v15 = vshll.u32 %v2742_v52, %v2889_v21  ;;  %v528_v20 = vshll.u32 %v2743_v54, %v2889_v21  ;;  %v505_v17 = vsel %vm495_vm14, nan, %v504_v18 }
  0xf6   : > { %vm801_vm4 = vcmp.eq.s32.totalorder %v3195_v62, 2  ;;  %vm2271_vm5 = vcmp.lt.s32.totalorder %v2270_v10, 0  ;;  %v965_v47 = vadd.s32 %v964_v55, %v960_v58  ;;  %v529_v22 = vshrl.u32 %v2744_v60, %v2906_v40  ;;  %1214 = vrot.lane.b32.xlu1 %v505_v17, %s2747_s13 }
  0xf7   : > { %vm798_vm6 = vcmp.eq.s32.totalorder %v3195_v62, 0  ;;  %v676_v46 = vsel %vm2271_vm5, 0, %v2270_v10  ;;  %v523_v13 = vshrl.u32 %v2741_v43, %v2906_v40  ;;  %v525_v39 = vshll.u32 %v2741_v43, %v2889_v21 }
  0xf8   : > { %v526_v33 = vshrl.u32 %v2743_v54, %v2906_v40  ;;  %vm797_vm7 = vcmp.lt.s32.totalorder %v3195_v62, 2  ;;  %v677_v59 = vsub.s32 32, %v676_v46  ;;  %v681_v51 = vsub.s32 4294967266, %v676_v46 }
  0xf9   : > { %v3227_v37 = vadd.s32 536870912, %v965_v47  ;;  %v531_v32 = vshll.u32 %v2744_v60, %v2889_v21  ;;  %vm795_vm8 = vweird.f32 %v2872_v48  ;;  %v678_v45 = vshll.u32 %v3161_v26, %v676_v46 }
  0xfa   : > { %v532_v23 = vshrl.u32 %v2745_v2, %v2906_v40  ;;  %v534_v5 = vshll.u32 %v2745_v2, %v2889_v21  ;;  %v535_v35 = vshrl.u32 %v2746_v7, %v2906_v40  ;;  %v679_v29 = vshrl.u32 %v661_v57, %v677_v59 }
  0xfb   : > { %v682_v36 = vadd.s32 127, %v681_v51  ;;  %v967_v27 = vshrl.u32 %v3227_v37, 30  ;;  %v530_v44 = vor.u32 %v529_v22, %v528_v20  ;;  %v692_v41 = vsel %vm607_vm1, 0, %v667_v16 }
  0xfc   : > { %v521_v26 = vshrl.u32 %v2742_v52, %v2906_v40  ;;  %v524_v63 = vor.u32 %v523_v13, %v522_v15  ;;  %vm540_vm9 = vcmp.lt.s32.totalorder %v2900_v34, 4  ;;  %v2580_v21 = vpop.eup %2579  ;;  %v680_v6 = vor.u32 %v679_v29, %v678_v45 }
  0xfd   : > { %v683_v53 = vshll.u32 %v682_v36, 23  ;;  %v968_v14 = vshll.u32 %v967_v27, 30  ;;  %vm537_vm10 = vcmp.lt.s32.totalorder %v2900_v34, 1  ;;  %v2582_v57 = vpop.eup %2581  ;;  %v802_v30 = vxor.u32 2147483648, %v2580_v21 }
  0xfe   : > { %v527_v24 = vor.u32 %v526_v33, %v525_v39  ;;  %v533_v10 = vor.u32 %v532_v23, %v531_v32  ;;  %v536_v58 = vor.u32 %v535_v35, %v534_v5  ;;  %v799_v16 = vxor.u32 2147483648, %v2582_v57 }
  0xff   : > { %v684_v18 = vor.u32 4788187, %v683_v53  ;;  %v3250_v55 = vsub.s32 %v965_v47, %v968_v14  ;;  %v542_v40 = vsel %vm540_vm9, %v530_v44, 2102212464  ;;  %v803_v15 = vsel %vm801_vm4, %v802_v30, %v2582_v57 }
 0x100   : > { %vm538_vm11 = vcmp.lt.s32.totalorder %v2900_v34, 2  ;;  %vm539_vm12 = vcmp.lt.s32.totalorder %v2900_v34, 3  ;;  %v541_v20 = vsel %vm537_vm10, %v521_v26, %v524_v63  ;;  %v800_v17 = vsel %vm798_vm6, %v2580_v21, %v799_v16 }
 0x101   : > { %v685_v22 = vand.u32 2147483647, %v684_v18  ;;  %v687_v46 = vcvt.s32.f32 %v680_v6  ;;  %v971_v47 = vsub.s32 0, %v3250_v55  ;;  %v804_v13 = vsel %vm797_vm7, %v800_v17, %v803_v15 }
 0x102   : > { %v543_v39 = vsel %vm539_vm12, %v527_v24, %v542_v40  ;;  %v545_v33 = vsel %vm537_vm10, %v524_v63, %v527_v24  ;;  %v546_v59 = vsel %vm540_vm9, %v533_v10, 920167782  ;;  %v805_v51 = vsel %vm795_vm8, nan, %v804_v13 }
 0x103   : > { %v688_v32 = vmul.f32 %v687_v46, %v685_v22  ;;  %v2281_v45 = vmin.u32 %v971_v47, %v3250_v55  ;;  %v547_v23 = vsel %vm539_vm12, %v530_v44, %v546_v59  ;;  %1220 = vrot.lane.b32.xlu1 %v805_v51, %s2747_s13  ;;  %v3277_v62 = vand.u32 3, %v692_v41 }
 0x104   : > { %v548_v5 = vsel %vm538_vm11, %v545_v33, %v547_v23  ;;  %v549_v35 = vsel %vm537_vm10, %v527_v24, %v530_v44  ;;  %v550_v48 = vsel %vm540_vm9, %v536_v58, 1326507024  ;;  %v544_v26 = vsel %vm538_vm11, %v541_v20, %v543_v39 }
 0x105   : > { %v691_v29 = vsel %vm607_vm1, %v2874_v49, %v688_v32  ;;  %v973_v36 = vclz %v2281_v45  ;;  %v551_v41 = vsel %vm539_vm12, %v533_v10, %v550_v48  ;;  %v3304_v57 = vshrl.u32 %v3078_v31, 5 }
 0x106   : > { %2583 = vcosq.f32 %v691_v29  ;;  %v552_v63 = vsel %vm538_vm11, %v549_v35, %v551_v41  ;;  %v3295_v44 = vmul.u32.u64.low %v2894_v28, %v548_v5  ;;  %v3296_v21 = vmul.u32.u64.high %v2894_v28, %v548_v5, %v3295_v44 }
 0x107   : > { %2585 = vsinq.f32 %v691_v29  ;;  %v2282_v6 = vadd.s32 4294967294, %v973_v36  ;;  %v3300_v53 = vmul.u32.u64.low %v2894_v28, %v552_v63  ;;  %v3301_v14 = vmul.u32.u64.high %v2894_v28, %v552_v63, %v3300_v53 }
 0x108   : > { %v3307_v30 = vadd.s32 1, %v3083_v4  ;;  %v1122_v34 = vshll.u32 %v2742_v52, %v3099_v12  ;;  %v1123_v24 = vshrl.u32 %v2741_v43, %v3183_v19  ;;  %vm907_vm13 = vcmp.le.f32.partialorder %v2878_v61, 0.7853982 }
 0x109   : > { %v961_v10 = vadd.s32 %v3178_v9, %v3190_v25  ;;  %vm2283_vm14 = vcmp.lt.s32.totalorder %v2282_v6, 0  ;;  %v560_v58 = vmul.u32 %v2894_v28, %v544_v26  ;;  %vm701_vm15 = vcmp.eq.s32.totalorder %v3277_v62, 2 }
 0x10a   : > { %v976_v31 = vsel %vm2283_vm14, 0, %v2282_v6  ;;  %v563_v4 = vadd.s32 1, %v3296_v21  ;;  %v1125_v16 = vshll.u32 %v2741_v43, %v3099_v12  ;;  %v1126_v18 = vshrl.u32 %v2743_v54, %v3183_v19 }
 0x10b   : > { %vm698_vm0 = vcmp.eq.s32.totalorder %v3277_v62, 0  ;;  %v977_v40 = vsub.s32 32, %v976_v31  ;;  %v981_v15 = vsub.s32 4294967266, %v976_v31  ;;  %v1128_v9 = vshll.u32 %v2743_v54, %v3099_v12 }
 0x10c   : > { %v1131_v28 = vshll.u32 %v2744_v60, %v3099_v12  ;;  %vm1016_vm1 = vcmp.gt.s32.totalorder %v3307_v30, 0  ;;  %vm697_vm2 = vcmp.lt.s32.totalorder %v3277_v62, 2  ;;  %vm562_vm3 = vc.u32 %v3301_v14, %v3295_v44 }
 0x10d   : > { %v1124_v25 = vor.u32 %v1123_v24, %v1122_v34  ;;  %v1129_v20 = vshrl.u32 %v2744_v60, %v3183_v19  ;;  %v1132_v17 = vshrl.u32 %v2745_v2, %v3183_v19  ;;  %vm695_vm4 = vweird.f32 %v2874_v49 }
 0x10e   : > { %v978_v22 = vshll.u32 %v3250_v55, %v976_v31  ;;  %v979_v46 = vshrl.u32 %v961_v10, %v977_v40  ;;  %v982_v47 = vadd.s32 127, %v981_v15  ;;  %v564_v13 = vsel %vm562_vm3, %v563_v4, %v3296_v21 }
 0x10f   : > { %v565_v39 = vadd.s32 %v564_v13, %v560_v58  ;;  %v1127_v33 = vor.u32 %v1126_v18, %v1125_v16  ;;  %v1134_v59 = vshll.u32 %v2745_v2, %v3099_v12  ;;  %v1135_v51 = vshrl.u32 %v2746_v7, %v3183_v19 }
 0x110   : > { %v980_v32 = vor.u32 %v979_v46, %v978_v22  ;;  %v983_v45 = vshll.u32 %v982_v47, 23  ;;  %v1133_v23 = vor.u32 %v1132_v17, %v1131_v28  ;;  %vm1137_vm5 = vcmp.lt.s32.totalorder %v3304_v57, 1  ;;  %v2584_v5 = vpop.eup %2583 }
 0x111   : > { %v992_v55 = vsel %vm907_vm13, 0, %v967_v27  ;;  %v3348_v35 = vadd.s32 536870912, %v565_v39  ;;  %v1130_v48 = vor.u32 %v1129_v20, %v1128_v9  ;;  %vm1140_vm6 = vcmp.lt.s32.totalorder %v3304_v57, 4  ;;  %v2586_v12 = vpop.eup %2585 }
 0x112   : > { %v702_v29 = vxor.u32 2147483648, %v2584_v5  ;;  %v984_v36 = vor.u32 4788187, %v983_v45  ;;  %v1121_v26 = vshrl.u32 %v2742_v52, %v3183_v19  ;;  %vm1139_vm7 = vcmp.lt.s32.totalorder %v3304_v57, 3 }
 0x113   : > { %v699_v41 = vxor.u32 2147483648, %v2586_v12  ;;  %v567_v63 = vshrl.u32 %v3348_v35, 30  ;;  %v1136_v37 = vor.u32 %v1135_v51, %v1134_v59  ;;  %v1145_v27 = vsel %vm1137_vm5, %v1124_v25, %v1127_v33 }
 0x114   : > { %v703_v21 = vsel %vm701_vm15, %v702_v29, %v2586_v12  ;;  %v985_v6 = vand.u32 2147483647, %v984_v36  ;;  %v987_v53 = vcvt.s32.f32 %v980_v32  ;;  %v1146_v34 = vsel %vm1140_vm6, %v1133_v23, 920167782 }
 0x115   : > { %v700_v19 = vsel %vm698_vm0, %v2584_v5, %v699_v41  ;;  %v568_v24 = vshll.u32 %v567_v63, 30  ;;  %vm1138_vm8 = vcmp.lt.s32.totalorder %v3304_v57, 2  ;;  %v1147_v10 = vsel %vm1139_vm7, %v1130_v48, %v1146_v34 }
 0x116   : > { %v704_v58 = vsel %vm697_vm2, %v700_v19, %v703_v21  ;;  %v988_v31 = vmul.f32 %v987_v53, %v985_v6  ;;  %v1142_v4 = vsel %vm1140_vm6, %v1130_v48, 2102212464  ;;  %v1148_v16 = vsel %vm1138_vm8, %v1145_v27, %v1147_v10 }
 0x117   : > { %v705_v18 = vsel %vm695_vm4, nan, %v704_v58  ;;  %v3376_v40 = vsub.s32 %v565_v39, %v568_v24  ;;  %v1149_v15 = vsel %vm1137_vm5, %v1127_v33, %v1130_v48  ;;  %v1150_v9 = vsel %vm1140_vm6, %v1136_v37, 1326507024 }
 0x118   : > { %v3385_v62 = vsel %vm1016_vm1, %v3307_v30, 0  ;;  %1218 = vrot.lane.b32.xlu0 %v705_v18, %s2747_s13  ;;  %v991_v49 = vsel %vm907_vm13, %v2878_v61, %v988_v31  ;;  %v3391_v28 = vand.u32 3, %v992_v55  ;;  %v1141_v20 = vsel %vm1137_vm5, %v1121_v26, %v1124_v25 }
 0x119   : > { %2587 = vcosq.f32 %v991_v49  ;;  %v571_v17 = vsub.s32 0, %v3376_v40  ;;  %v1143_v22 = vsel %vm1139_vm7, %v1127_v33, %v1142_v4  ;;  %v1151_v30 = vsel %vm1139_vm7, %v1133_v23, %v1150_v9 }
 0x11a   : > { %2589 = vsinq.f32 %v991_v49  ;;  %v1152_v46 = vsel %vm1138_vm8, %v1149_v15, %v1151_v30  ;;  %v3403_v47 = vmul.u32.u64.low %v3081_v1, %v1148_v16  ;;  %v3404_v13 = vmul.u32.u64.high %v3081_v1, %v1148_v16, %v3403_v47 }
 0x11b   : > { %v1012_v25 = vand.u32 8388607, %v2951_v50  ;;  %v2265_v39 = vmin.u32 %v571_v17, %v3376_v40  ;;  %v3410_v59 = vmul.u32.u64.low %v3081_v1, %v1152_v46  ;;  %v3411_v51 = vmul.u32.u64.high %v3081_v1, %v1152_v46, %v3410_v59 }
 0x11c   : > { %v3414_v33 = vand.u32 31, %v3385_v62  ;;  %v1144_v32 = vsel %vm1138_vm8, %v1141_v20, %v1143_v22  ;;  %v822_v45 = vshll.u32 %v2742_v52, %v3011_v8  ;;  %v823_v23 = vshrl.u32 %v2741_v43, %v3067_v42 }
 0x11d   : > { %v573_v5 = vclz %v2265_v39  ;;  %v825_v55 = vshll.u32 %v2741_v43, %v3011_v8  ;;  %v826_v48 = vshrl.u32 %v2743_v54, %v3067_v42  ;;  %v828_v12 = vshll.u32 %v2743_v54, %v3011_v8 }
 0x11e   : > { %vm998_vm9 = vcmp.eq.s32.totalorder %v3391_v28, 0  ;;  %vm1001_vm10 = vcmp.eq.s32.totalorder %v3391_v28, 2  ;;  %v1163_v57 = vadd.s32 1, %v3404_v13  ;;  %v829_v29 = vshrl.u32 %v2744_v60, %v3067_v42 }
 0x11f   : > { %v831_v36 = vshll.u32 %v2744_v60, %v3011_v8  ;;  %vm997_vm11 = vcmp.lt.s32.totalorder %v3391_v28, 2  ;;  %v561_v26 = vadd.s32 %v3295_v44, %v3301_v14  ;;  %v2266_v41 = vadd.s32 4294967294, %v573_v5 }
 0x120   : > { %v1160_v37 = vmul.u32 %v3081_v1, %v1144_v32  ;;  %vm1162_vm12 = vc.u32 %v3411_v51, %v3403_v47  ;;  %v821_v21 = vshrl.u32 %v2742_v52, %v3067_v42  ;;  %v824_v6 = vor.u32 %v823_v23, %v822_v45 }
 0x121   : > { %v1164_v27 = vsel %vm1162_vm12, %v1163_v57, %v3404_v13  ;;  %v832_v53 = vshrl.u32 %v2745_v2, %v3067_v42  ;;  %vm2267_vm13 = vcmp.lt.s32.totalorder %v2266_v41, 0  ;;  %v827_v19 = vor.u32 %v826_v48, %v825_v55 }
 0x122   : > { %v1165_v34 = vadd.s32 %v1164_v27, %v1160_v37  ;;  %v830_v24 = vor.u32 %v829_v29, %v828_v12  ;;  %v576_v44 = vsel %vm2267_vm13, 0, %v2266_v41  ;;  %v834_v1 = vshll.u32 %v2745_v2, %v3011_v8 }
 0x123   : > { %v833_v14 = vor.u32 %v832_v53, %v831_v36  ;;  %v835_v10 = vshrl.u32 %v2746_v7, %v3067_v42  ;;  %v2588_v58 = vpop.eup %2587  ;;  %vm507_vm14 = vcmp.le.f32.partialorder %v2866_v38, 0.7853982  ;;  %v577_v31 = vsub.s32 32, %v576_v44 }
 0x124   : > { %v581_v4 = vsub.s32 4294967266, %v576_v44  ;;  %v3451_v16 = vadd.s32 536870912, %v1165_v34  ;;  %vm837_vm15 = vcmp.lt.s32.totalorder %v3005_v3, 1  ;;  %v2590_v18 = vpop.eup %2589  ;;  %v1002_v15 = vxor.u32 2147483648, %v2588_v58 }
 0x125   : > { %v578_v9 = vshll.u32 %v3376_v40, %v576_v44  ;;  %vm839_vm0 = vcmp.lt.s32.totalorder %v3005_v3, 3  ;;  %vm840_vm1 = vcmp.lt.s32.totalorder %v3005_v3, 4  ;;  %v999_v8 = vxor.u32 2147483648, %v2590_v18 }
 0x126   : > { %v579_v49 = vshrl.u32 %v561_v26, %v577_v31  ;;  %v582_v42 = vadd.s32 127, %v581_v4  ;;  %v1167_v20 = vshrl.u32 %v3451_v16, 30  ;;  %v1003_v17 = vsel %vm1001_vm10, %v1002_v15, %v2590_v18 }
 0x127   : > { %v836_v22 = vor.u32 %v835_v10, %v834_v1  ;;  %v842_v30 = vsel %vm840_vm1, %v830_v24, 2102212464  ;;  %v846_v46 = vsel %vm840_vm1, %v833_v14, 920167782  ;;  %v1000_v40 = vsel %vm998_vm9, %v2588_v58, %v999_v8 }
 0x128   : > { %v580_v13 = vor.u32 %v579_v49, %v578_v9  ;;  %v583_v39 = vshll.u32 %v582_v42, 23  ;;  %v1168_v59 = vshll.u32 %v1167_v20, 30  ;;  %vm995_vm2 = vweird.f32 %v2878_v61 }
 0x129   : > { %v1004_v32 = vsel %vm997_vm11, %v1000_v40, %v1003_v17  ;;  %v845_v45 = vsel %vm837_vm15, %v824_v6, %v827_v19  ;;  %v847_v23 = vsel %vm839_vm0, %v830_v24, %v846_v46  ;;  %vm838_vm3 = vcmp.lt.s32.totalorder %v3005_v3, 2 }
 0x12a   : > { %v1005_v5 = vsel %vm995_vm2, nan, %v1004_v32  ;;  %v584_v55 = vor.u32 4788187, %v583_v39  ;;  %v3475_v48 = vsub.s32 %v1165_v34, %v1168_v59  ;;  %v587_v12 = vcvt.s32.f32 %v580_v13 }
 0x12b   : > { %1224 = vrot.lane.b32.xlu1 %v1005_v5, %s2747_s13  ;;  %v841_v61 = vsel %vm837_vm15, %v821_v21, %v824_v6  ;;  %v843_v28 = vsel %vm839_vm0, %v827_v19, %v842_v30  ;;  %v849_v57 = vsel %vm837_vm15, %v827_v19, %v830_v24  ;;  %v848_v26 = vsel %vm838_vm3, %v845_v45, %v847_v23 }
 0x12c   : > { %v585_v29 = vand.u32 2147483647, %v584_v55  ;;  %v1171_v36 = vsub.s32 0, %v3475_v48  ;;  %v850_v41 = vsel %vm840_vm1, %v836_v22, 1326507024  ;;  %v1013_v37 = vor.u32 8388608, %v1012_v25 }
 0x12d   : > { %v1020_v27 = vsub.s32 32, %v3414_v33  ;;  %v592_v21 = vsel %vm507_vm14, 0, %v567_v63  ;;  %v851_v6 = vsel %vm839_vm0, %v833_v14, %v850_v41  ;;  %v844_v19 = vsel %vm838_vm3, %v841_v61, %v843_v28 }
 0x12e   : > { %v588_v53 = vmul.f32 %v587_v12, %v585_v29  ;;  %v2289_v34 = vmin.u32 %v1171_v36, %v3475_v48  ;;  %v852_v24 = vsel %vm838_vm3, %v849_v57, %v851_v6  ;;  %v3517_v10 = vshrl.u32 %v3385_v62, 5 }
 0x12f   : > { %v3505_v25 = vmul.u32.u64.low %v2933_v11, %v852_v24  ;;  %v3506_v44 = vmul.u32.u64.high %v2933_v11, %v852_v24, %v3505_v25  ;;  %v3509_v35 = vmul.u32.u64.low %v2933_v11, %v848_v26  ;;  %v3510_v1 = vmul.u32.u64.high %v2933_v11, %v848_v26, %v3509_v35 }
 0x130   : > { %v591_v63 = vsel %vm507_vm14, %v2866_v38, %v588_v53  ;;  %v1173_v14 = vclz %v2289_v34  ;;  %v3519_v58 = vshll.u32 %v1013_v37, 8  ;;  %v3521_v3 = vand.u32 3, %v592_v21 }
 0x131   : > { %2591 = vcosq.f32 %v591_v63  ;;  %v860_v4 = vmul.u32 %v2933_v11, %v844_v19  ;;  %v1022_v18 = vshll.u32 %v2742_v52, %v3414_v33  ;;  %vm862_vm4 = vc.u32 %v3506_v44, %v3509_v35 }
 0x132   : > { %2593 = vsinq.f32 %v591_v63  ;;  %v2290_v31 = vadd.s32 4294967294, %v1173_v14  ;;  %v863_v15 = vadd.s32 1, %v3510_v1  ;;  %v1023_v62 = vshrl.u32 %v2741_v43, %v1020_v27 }
 0x133   : > { %v1025_v9 = vshll.u32 %v2741_v43, %v3414_v33  ;;  %v1026_v8 = vshrl.u32 %v2743_v54, %v1020_v27  ;;  %v1028_v49 = vshll.u32 %v2743_v54, %v3414_v33  ;;  %v1031_v11 = vshll.u32 %v2744_v60, %v3414_v33 }
 0x134   : > { %vm2291_vm5 = vcmp.lt.s32.totalorder %v2290_v31, 0  ;;  %v864_v17 = vsel %vm862_vm4, %v863_v15, %v3510_v1  ;;  %v1029_v22 = vshrl.u32 %v2744_v60, %v1020_v27  ;;  %v1032_v30 = vshrl.u32 %v2745_v2, %v1020_v27 }
 0x135   : > { %v1176_v42 = vsel %vm2291_vm5, 0, %v2290_v31  ;;  %v1161_v46 = vadd.s32 %v3403_v47, %v3411_v51  ;;  %v865_v13 = vadd.s32 %v864_v17, %v860_v4  ;;  %vm597_vm6 = vcmp.lt.s32.totalorder %v3521_v3, 2 }
 0x136   : > { %v1177_v43 = vsub.s32 32, %v1176_v42  ;;  %v1181_v40 = vsub.s32 4294967266, %v1176_v42  ;;  %v1033_v39 = vor.u32 %v1032_v30, %v1031_v11  ;;  %v1034_v54 = vshll.u32 %v2745_v2, %v3414_v33 }
 0x137   : > { %v1035_v59 = vshrl.u32 %v2746_v7, %v1020_v27  ;;  %vm595_vm7 = vweird.f32 %v2866_v38  ;;  %v1178_v60 = vshll.u32 %v3475_v48, %v1176_v42  ;;  %v3548_v23 = vadd.s32 536870912, %v865_v13 }
 0x138   : > { %v1179_v32 = vshrl.u32 %v1161_v46, %v1177_v43  ;;  %v1182_v45 = vadd.s32 127, %v1181_v40  ;;  %vm598_vm8 = vcmp.eq.s32.totalorder %v3521_v3, 0  ;;  %vm1107_vm9 = vcmp.le.f32.partialorder %v2922_v56, 0.7853982  ;;  %v3616_v40 = vld [vmem:[%s2826_s15] sm:$0xff] }
 0x139   : > { %v1024_v47 = vor.u32 %v1023_v62, %v1022_v18  ;;  %v1027_v51 = vor.u32 %v1026_v8, %v1025_v9  ;;  %v1030_v5 = vor.u32 %v1029_v22, %v1028_v49  ;;  %v867_v2 = vshrl.u32 %v3548_v23, 30  ;;  %v1302_v9 = vld [vmem:[%s3855_s4] sm:$0xff]  ;;  %v1303_v8 = vld [vmem:[%s3855_s4 + $0x8] sm:$0x3f] }
 0x13a   : > { %v1180_v55 = vor.u32 %v1179_v32, %v1178_v60  ;;  %v1183_v12 = vshll.u32 %v1182_v45, 23  ;;  %vm1040_vm10 = vcmp.lt.s32.totalorder %v3517_v10, 4  ;;  %vm601_vm11 = vcmp.eq.s32.totalorder %v3521_v3, 2 }
 0x13b   : > { %v2592_v7 = vpop.eup %2591  ;;  %v1021_v33 = vshrl.u32 %v2742_v52, %v1020_v27  ;;  %v1036_v48 = vor.u32 %v1035_v59, %v1034_v54  ;;  %v1046_v61 = vsel %vm1040_vm10, %v1033_v39, 920167782  ;;  %v868_v36 = vshll.u32 %v867_v2, 30 }
 0x13c   : > { %v2594_v28 = vpop.eup %2593  ;;  %v602_v57 = vxor.u32 2147483648, %v2592_v7  ;;  %v1184_v29 = vor.u32 4788187, %v1183_v12  ;;  %vm1037_vm12 = vcmp.lt.s32.totalorder %v3517_v10, 1  ;;  %v1187_v41 = vcvt.s32.f32 %v1180_v55  ;;  %v3640_v55 = vld [vmem:[%s2826_s15 + $0x10] sm:$0xff] }
 0x13d   : > { %v599_v26 = vxor.u32 2147483648, %v2594_v28  ;;  %vm1039_vm13 = vcmp.lt.s32.totalorder %v3517_v10, 3  ;;  %v1045_v37 = vsel %vm1037_vm12, %v1024_v47, %v1027_v51  ;;  %v3564_v21 = vsub.s32 %v865_v13, %v868_v36 }
 0x13e   : > { %v603_v52 = vsel %vm601_vm11, %v602_v57, %v2594_v28  ;;  %v1185_v27 = vand.u32 2147483647, %v1184_v29  ;;  %v1047_v6 = vsel %vm1039_vm13, %v1030_v5, %v1046_v61  ;;  %v1042_v34 = vsel %vm1040_vm10, %v1030_v5, 2102212464  ;;  %v3650_v29 = vld [vmem:[%s2826_s15 + $0x18] sm:$0xff] }
 0x13f   : > { %v600_v53 = vsel %vm598_vm8, %v2592_v7, %v599_v26  ;;  %v1049_v19 = vsel %vm1037_vm12, %v1027_v51, %v1030_v5  ;;  %v1050_v24 = vsel %vm1040_vm10, %v1036_v48, 1326507024  ;;  %v871_v63 = vsub.s32 0, %v3564_v21 }
 0x140   : > { %v604_v25 = vsel %vm597_vm6, %v600_v53, %v603_v52  ;;  %v1188_v1 = vmul.f32 %v1187_v41, %v1185_v27  ;;  %vm1038_vm14 = vcmp.lt.s32.totalorder %v3517_v10, 2  ;;  %v1041_v31 = vsel %vm1037_vm12, %v1021_v33, %v1024_v47  ;;  %v2707_v41 = vld [vmem:[%s2826_s15 + $0x20] sm:$0xff] }
 0x141   : > { %v605_v14 = vsel %vm595_vm7, nan, %v604_v25  ;;  %v1048_v4 = vsel %vm1038_vm14, %v1045_v37, %v1047_v6  ;;  %v1051_v18 = vsel %vm1039_vm13, %v1033_v39, %v1050_v24  ;;  %v2277_v15 = vmin.u32 %v871_v63, %v3564_v21  ;;  %v3663_v24 = vld [vmem:[%s2826_s15 + $0x28] sm:$0xff]  ;;  %v2710_v63 = vld [vmem:[%s2826_s15 + $0x30] sm:$0xff] }
 0x142   : > { %1216 = vrot.lane.b32.xlu0 %v605_v14, %s2747_s13  ;;  %v1191_v3 = vsel %vm1107_vm9, %v2922_v56, %v1188_v1  ;;  %v1043_v38 = vsel %vm1039_vm13, %v1027_v51, %v1042_v34  ;;  %v1052_v62 = vsel %vm1038_vm14, %v1049_v19, %v1051_v18  ;;  %vm1382_vm15 = vcmask 1045504  }
 0x143   : > { %2595 = vcosq.f32 %v1191_v3  ;;  %v3604_v49 = vmul.u32.u64.low %v3519_v58, %v1052_v62  ;;  %v3605_v11 = vmul.u32.u64.high %v3519_v58, %v1052_v62, %v3604_v49  ;;  %v873_v42 = vclz %v2277_v15 }
 0x144   : > { %2597 = vsinq.f32 %v1191_v3  ;;  %v3608_v17 = vmul.u32.u64.low %v3519_v58, %v1048_v4  ;;  %v3609_v22 = vmul.u32.u64.high %v3519_v58, %v1048_v4, %v3608_v17  ;;  %v2466_v30 = vpack.c.bf16 %v1303_v8, %v1302_v9  ;;  %v3685_v9 = vpop.permute.xlu1 %1258 }
 0x145   : > { %vm1357_vm0 = vcmask 113664   ;;  %v2278_v46 = vadd.s32 4294967294, %v873_v42  ;;  %v1044_v43 = vsel %vm1038_vm14, %v1041_v31, %v1043_v38  ;;  %vm2748_vm1 = vmmov 1  }
 0x146   : > { %vm2467_vm2 = vmpackc.low %vm1382_vm15, %vm2748_vm1  ;;  %2392 = vmatprep.mubr.msk.f32.mxu0 %vm1357_vm0, %v3616_v40  ;;  %vm1062_vm3 = vc.u32 %v3605_v11, %v3608_v17  ;;  %v1192_v13 = vsel %vm1107_vm9, 0, %v1167_v20  ;;  %v1063_v10 = vadd.s32 1, %v3609_v22  ;;  %v1060_v54 = vmul.u32 %v3519_v58, %v1044_v43  ;;  %v3634_v20 = vld [vmem:[%s2826_s15 + $0x8] sm:$0xff] }
 0x147   : > { %2468 = vmatprep.subr.msk.bf16.mxu0 %vm2467_vm2, %v2466_v30  ;;  %vm2279_vm4 = vcmp.lt.s32.totalorder %v2278_v46, 0  ;;  %v861_v59 = vadd.s32 %v3509_v35, %v3506_v44  ;;  %v1196_v16 = vand.u32 3, %v1192_v13  ;;  %v2749_v61 = vmov 3  }
 0x148   : > { %2471 = vmatpush3.bf16.msk.msra.mxu0 %vm2467_vm2, %v2466_v30  ;;  %v876_v39 = vsel %vm2279_vm4, 0, %v2278_v46  ;;  %v1064_v45 = vsel %vm1062_vm3, %v1063_v10, %v3609_v22  ;;  %2573 = vset.pattern.permute.xlu0 %v2749_v61  ;;  %vm1195_vm7 = vweird.f32 %v2922_v56  ;;  %v3660_v53 = vstv %s3631_s19  ;;  %v2709_v56 = vld [vmem:[%s2826_s15 + $0x38] sm:$0xff]  ;;  %v1261_v10 = vpop.permute.xlu1 %1260 }
 0x149   : > { %v877_v60 = vsub.s32 32, %v876_v39  ;;  %v881_v32 = vsub.s32 4294967266, %v876_v39  ;;  %v1065_v47 = vadd.s32 %v1064_v45, %v1060_v54  ;;  %v878_v51 = vshll.u32 %v3564_v21, %v876_v39  ;;  %2574 = vset.pattern.permute.xlu1 %v2749_v61 }
 0x14a   : > { %vm1201_vm5 = vcmp.eq.s32.totalorder %v1196_v16, 2  ;;  %vm1198_vm6 = vcmp.eq.s32.totalorder %v1196_v16, 0  ;;  %vm1197_vm8 = vcmp.lt.s32.totalorder %v1196_v16, 2  ;;  %v319_v25 = vmul.f32 %v2709_v56, %v3660_v53 }
 0x14b   : > { %2393 = vmatmul.mubr.msk.f32.vlgmr.msra.gmra.mrb[0].mxu0 %vm1357_vm0, %v3634_v20  ;;  %v879_v5 = vshrl.u32 %v861_v59, %v877_v60  ;;  %v882_v58 = vadd.s32 127, %v881_v32  ;;  %v3646_v35 = vadd.s32 536870912, %v1065_v47  ;;  %v3673_v14 = vstv %s3644_s20 }
 0x14c   : > { %2395 = vmatprep.mubr.msk.f32.mxu0 %vm1357_vm0, %v3640_v55  ;;  %vm807_vm9 = vcmp.le.f32.partialorder %v2880_v0, 0.7853982  ;;  %v3677_v4 = vadd.f32 %v3673_v14, %v319_v25  ;;  %v316_v18 = vmul.f32 %v2707_v41, %v3660_v53  ;;  %v1061_v30 = vadd.s32 %v3608_v17, %v3605_v11 }
 0x14d   : > { %v2596_v44 = vpop.eup %2595  ;;  %v880_v33 = vor.u32 %v879_v5, %v878_v51  ;;  %v883_v48 = vshll.u32 %v882_v58, 23  ;;  %v1067_v57 = vshrl.u32 %v3646_v35, 30  ;;  %v892_v8 = vsel %vm807_vm9, 0, %v867_v2  ;;  %v1265_v58 = vpop.permute.xlu1 %1264 }
 0x14e   : > { %v2598_v12 = vpop.eup %2597  ;;  %v1202_v7 = vxor.u32 2147483648, %v2596_v44  ;;  %v3683_v38 = vadd.f32 %v3673_v14, %v316_v18  ;;  %v896_v42 = vand.u32 3, %v892_v8  ;;  %v318_v13 = vmul.f32 %v2710_v63, %v3660_v53 }
 0x14f   : > { %v1199_v28 = vxor.u32 2147483648, %v2598_v12  ;;  %2396 = vmatmul.mubr.msk.f32.gmra.mrb[2].mxu0 %vm1357_vm0, %v3650_v29  ;;  %v884_v26 = vor.u32 4788187, %v883_v48  ;;  %v1068_v52 = vshll.u32 %v1067_v57, 30  ;;  %v887_v6 = vcvt.s32.f32 %v880_v33 }
 0x150   : > { %v1203_v36 = vsel %vm1201_vm5, %v1202_v7, %v2598_v12  ;;  %2398 = vmatprep.mubr.msk.f32.mxu0 %vm1357_vm0, %v2707_v41  ;;  %v3693_v32 = vadd.f32 %v3673_v14, %v318_v13  ;;  %vm901_vm11 = vcmp.eq.s32.totalorder %v896_v42, 2  ;;  %vm898_vm12 = vcmp.eq.s32.totalorder %v896_v42, 0 }
 0x151   : > { %v1200_v37 = vsel %vm1198_vm6, %v2596_v44, %v1199_v28  ;;  %v885_v21 = vand.u32 2147483647, %v884_v26  ;;  %v1069_v19 = vsub.s32 %v1065_v47, %v1068_v52  ;;  %vm897_vm13 = vcmp.lt.s32.totalorder %v896_v42, 2  ;;  %v1255_v28 = vpop.permute.xlu0 %1254 }
 0x152   : > { %v1204_v27 = vsel %vm1197_vm8, %v1200_v37, %v1203_v36  ;;  %vm895_vm14 = vweird.f32 %v2880_v0  ;;  %v312_v48 = vmul.f32 %v3616_v40, %v3660_v53  ;;  %vm1007_vm15 = vcmp.le.f32.partialorder %v2951_v50, 0.7853982  ;;  %v3701_v36 = vpop.permute.xlu1 %1268 }
 0x153   : > { %v1205_v34 = vsel %vm1195_vm7, nan, %v1204_v27  ;;  %2399 = vmatmul.mubr.msk.f32.gmra.mrb[4].mxu0 %vm1357_vm0, %v3663_v24  ;;  %v888_v1 = vmul.f32 %v887_v6, %v885_v21  ;;  %v1071_v31 = vsub.s32 0, %v1069_v19  ;;  %v315_v26 = vmul.f32 %v3650_v29, %v3660_v53 }
 0x154   : > { %1228 = vrot.lane.b32.xlu1 %v1205_v34, %s2747_s13  ;;  %2401 = vmatprep.mubr.msk.f32.mxu0 %vm1357_vm0, %v2710_v63  ;;  %v1092_v41 = vsel %vm1007_vm15, 0, %v1067_v57  ;;  %vm1095_vm4 = vweird.f32 %v2951_v50  ;;  %vm1586_vm5 = vcmask 1042432   ;;  %vm2751_vm7 = vmmov 0  }
 0x155   : > { %v891_v3 = vsel %vm807_vm9, %v2880_v0, %v888_v1  ;;  %v2285_v15 = vmin.u32 %v1071_v31, %v1069_v19  ;;  %v322_v0 = vadd.f32 %v3673_v14, %v312_v48  ;;  %v325_v40 = vadd.f32 %v3673_v14, %v315_v26  ;;  %v1257_v31 = vpop.permute.xlu0 %1256  ;;  %vm3738_vm6 = vmpackc.low %vm1586_vm5, %vm2748_vm1 }
 0x156   : > { %2599 = vcosq.f32 %v891_v3  ;;  %v1096_v27 = vand.u32 3, %v1092_v41  ;;  %vm1561_vm1 = vcmask 220160   ;;  %vm1747_vm8 = vcmask 130048  }
 0x157   : > { %2402 = vmatmul.mubr.msk.f32.gmra.mrb[6].mxu0 %vm1357_vm0, %v2709_v56  ;;  %2601 = vsinq.f32 %v891_v3  ;;  %v1073_v62 = vclz %v2285_v15  ;;  %v398_v37 = vmul.f32 3.0, %v322_v0  ;;  %v401_v6 = vmul.f32 3.0, %v325_v40 }
 0x158   : > { %vm1101_vm0 = vcmp.eq.s32.totalorder %v1096_v27, 2  ;;  %vm1098_vm2 = vcmp.eq.s32.totalorder %v1096_v27, 0  ;;  %vm1097_vm3 = vcmp.lt.s32.totalorder %v1096_v27, 2  ;;  %vm2173_vm9 = vcmask 15360  }
 0x159   : > { %v2286_v49 = vadd.s32 4294967294, %v1073_v62  ;;  %v1263_v42 = vpop.permute.xlu0 %1262 }
 0x15b   : > { %vm2287_vm10 = vcmp.lt.s32.totalorder %v2286_v49, 0 }
 0x15c   : > { %v1076_v22 = vsel %vm2287_vm10, 0, %v2286_v49 }
 0x15d   : > { %v1077_v46 = vsub.s32 32, %v1076_v22  ;;  %v1081_v43 = vsub.s32 4294967266, %v1076_v22  ;;  %v1078_v54 = vshll.u32 %v1069_v19, %v1076_v22  ;;  %v314_v22 = vmul.f32 %v3640_v55, %v3660_v53 }
 0x15f   : > { %v1079_v59 = vshrl.u32 %v1061_v30, %v1077_v46  ;;  %v1082_v60 = vadd.s32 127, %v1081_v43  ;;  %v324_v46 = vadd.f32 %v3673_v14, %v314_v22  ;;  %v1267_v43 = vpop.permute.xlu0 %1266 }
 0x160   : > { %v2600_v39 = vpop.eup %2599 }
 0x161   : > { %v2602_v23 = vpop.eup %2601  ;;  %v902_v2 = vxor.u32 2147483648, %v2600_v39  ;;  %v1080_v16 = vor.u32 %v1079_v59, %v1078_v54  ;;  %v1083_v47 = vshll.u32 %v1082_v60, 23  ;;  %v317_v60 = vmul.f32 %v3663_v24, %v3660_v53 }
 0x162   : > { %v899_v45 = vxor.u32 2147483648, %v2602_v23 }
 0x163   : > { %v903_v11 = vsel %vm901_vm11, %v902_v2, %v2602_v23  ;;  %v1084_v51 = vor.u32 4788187, %v1083_v47  ;;  %v1087_v7 = vcvt.s32.f32 %v1080_v16  ;;  %v327_v55 = vadd.f32 %v3673_v14, %v317_v60 }
 0x164   : > { %v900_v17 = vsel %vm898_vm12, %v2600_v39, %v899_v45 }
 0x165   : > { %v904_v5 = vsel %vm897_vm13, %v900_v17, %v903_v11  ;;  %v1085_v12 = vand.u32 2147483647, %v1084_v51  ;;  %v403_v23 = vmul.f32 3.0, %v327_v55  ;;  %v313_v11 = vmul.f32 %v3634_v20, %v3660_v53 }
 0x166   : > { %v905_v44 = vsel %vm895_vm14, nan, %v904_v5  ;;  %v402_v20 = vmul.f32 3.0, %v3683_v38  ;;  %v1552_v38 = vld [vmem:[%s3856_s5] sm:$0xff] }
 0x167   : > { %1222 = vrot.lane.b32.xlu0 %v905_v44, %s2747_s13  ;;  %v1088_v33 = vmul.f32 %v1087_v7, %v1085_v12  ;;  %v323_v17 = vadd.f32 %v3673_v14, %v313_v11  ;;  %v405_v7 = vmul.f32 3.0, %v3677_v4 }
 0x168   : > { %v1215_v52 = vpop.permute.xlu1 %1214 }
 0x169   : > { %v1091_v61 = vsel %vm1007_vm15, %v2951_v50, %v1088_v33  ;;  %v1238_v21 = vmul.f32 %v1215_v52, %v398_v37  ;;  %v400_v50 = vmul.f32 3.0, %v324_v46  ;;  %v399_v51 = vmul.f32 3.0, %v323_v17 }
 0x16a   : > { %2603 = vcosq.f32 %v1091_v61 }
 0x16b   : > { %2605 = vsinq.f32 %v1091_v61 }
 0x16c   : > { %2607 = vrcp.f32 %v1255_v28 }
 0x16d   : > { %2609 = vrcp.f32 %v1261_v10 }
 0x16e   : > { %2611 = vrcp.f32 %v3685_v9 }
 0x16f   : > { %2613 = vrcp.f32 %v1265_v58 }
 0x170   : > { %2615 = vrcp.f32 %v1257_v31 }
 0x171   : > { %2617 = vrcp.f32 %v3701_v36  ;;  %v404_v36 = vmul.f32 3.0, %v3693_v32 }
 0x172   : > { %2619 = vrcp.f32 %v1263_v42 }
 0x173   : > { %2621 = vrcp.f32 %v1267_v43 }
 0x174   : > { %v2604_v34 = vpop.eup %2603 }
 0x175   : > { %v2606_v19 = vpop.eup %2605  ;;  %v1102_v56 = vxor.u32 2147483648, %v2604_v34  ;;  %v1221_v63 = vpop.permute.xlu1 %1220 }
 0x176   : > { %v2608_v25 = vpop.eup %2607  ;;  %v1099_v1 = vxor.u32 2147483648, %v2606_v19  ;;  %v1241_v57 = vmul.f32 %v1221_v63, %v401_v6  ;;  %v1553_v6 = vld [vmem:[%s3856_s5 + $0x8] sm:$0xff] }
 0x177   : > { %v1103_v29 = vsel %vm1101_vm0, %v1102_v56, %v2606_v19  ;;  %v1279_v35 = vmul.f32 %v2608_v25, %v1238_v21  ;;  %v2610_v15 = vpop.eup %2609  ;;  %v2472_v32 = vpack.c.bf16 %v1553_v6, %v1552_v38  ;;  %v1555_v19 = vld [vmem:[%s3856_s5 + $0x18] sm:$0x7]  ;;  %v3753_v63 = vld [vmem:[%s3855_s4 + $0xe] ss:$0 sm:$0xff]  ;;  %v2333_v56 = vld [vmem:[%s3857_s6 + $0x1b] ss:$0 sm:$0xff] }
 0x178   : > { %v1100_v18 = vsel %vm1098_vm2, %v2604_v34, %v1099_v1  ;;  %v1285_v49 = vmul.f32 %v2610_v15, %v1241_v57  ;;  %v2612_v39 = vpop.eup %2611  ;;  %v1554_v34 = vld [vmem:[%s3856_s5 + $0x10] sm:$0xff] }
 0x179   : > { %v1104_v3 = vsel %vm1097_vm3, %v1100_v18, %v1103_v29  ;;  %v1294_v8 = vmax.f32 %v1279_v35, 0.0  ;;  %v2614_v45 = vpop.eup %2613  ;;  %v2476_v25 = vpack.c.bf16 %v1555_v19, %v1554_v34  ;;  %2504 = vmatprep.subr.bf16.mxu1 %v2472_v32  ;;  %2473 = vmatprep.subr.bf16.mxu0 %v2472_v32 }
 0x17a   : > { %v1105_v62 = vsel %vm1095_vm4, nan, %v1104_v3  ;;  %v1297_v30 = vmax.f32 %v1285_v49, 0.0  ;;  %v2616_v44 = vpop.eup %2615  ;;  %2506 = vmatpush3.bf16.msra.mxu1 %v2472_v32  ;;  %2475 = vmatpush3.bf16.msra.mxu0 %v2472_v32  ;;  %v3759_v3 = vld [vmem:[%s3855_s4 + $0xf] ss:$0 sm:$0xff] }
 0x17b   : > { %1226 = vrot.lane.b32.xlu0 %v1105_v62, %s2747_s13  ;;  %v2618_v61 = vpop.eup %2617  ;;  %2505 = vmatprep.subr.msk.bf16.mxu1 %vm3738_vm6, %v2476_v25 }
 0x17c   : > { %v2620_v26 = vpop.eup %2619  ;;  %2478 = vmatprep.subr.msk.bf16.mxu0 %vm3738_vm6, %v2476_v25 }
 0x17d   : > { %v2622_v52 = vpop.eup %2621 }
 0x17e   : > { %2507 = vmatpush3.bf16.msk.msra.mxu1 %vm3738_vm6, %v2476_v25  ;;  %2481 = vmatpush3.bf16.msk.msra.mxu0 %vm3738_vm6, %v2476_v25 }
 0x17f   : > { %1307 = vperm.xlu0 %2573, %v1294_v8  }
 0x183   : > { %1322 = vperm.xlu0 %2573, %v1297_v30  }
 0x18a   : > { %v1219_v13 = vpop.permute.xlu0 %1218 }
 0x18b   : > { %v1240_v10 = vmul.f32 %v1219_v13, %v400_v50 }
 0x18d   : > { %v1283_v54 = vmul.f32 %v2612_v39, %v1240_v10 }
 0x18f   : > { %v1296_v59 = vmax.f32 %v1283_v54, 0.0 }
 0x191   : > { %1317 = vperm.xlu1 %2574, %v1296_v59  }
 0x19d   : > { %v1225_v2 = vpop.permute.xlu1 %1224 }
 0x19e   : > { %v1243_v9 = vmul.f32 %v1225_v2, %v403_v23 }
 0x1a0   : > { %v1289_v16 = vmul.f32 %v2614_v45, %v1243_v9 }
 0x1a2   : > { %v1299_v47 = vmax.f32 %v1289_v16, 0.0 }
 0x1a4   : > { %1332 = vperm.xlu0 %2573, %v1299_v47  }
 0x1b4   : > { %v1217_v5 = vpop.permute.xlu0 %1216 }
 0x1b5   : > { %v1239_v24 = vmul.f32 %v1217_v5, %v399_v51 }
 0x1b7   : > { %v1281_v58 = vmul.f32 %v2616_v44, %v1239_v24 }
 0x1b9   : > { %v1295_v12 = vmax.f32 %v1281_v58, 0.0 }
 0x1bb   : > { %1312 = vperm.xlu1 %2574, %v1295_v12  }
 0x1c6   : > { %v1229_v33 = vpop.permute.xlu1 %1228 }
 0x1c7   : > { %v1245_v48 = vmul.f32 %v1229_v33, %v405_v7 }
 0x1c9   : > { %v1293_v28 = vmul.f32 %v2618_v61, %v1245_v48 }
 0x1cb   : > { %v1301_v0 = vmax.f32 %v1293_v28, 0.0 }
 0x1cd   : > { %1342 = vperm.xlu0 %2573, %v1301_v0  }
 0x1d9   : > { %v1223_v53 = vpop.permute.xlu0 %1222 }
 0x1da   : > { %v1242_v14 = vmul.f32 %v1223_v53, %v402_v20 }
 0x1dc   : > { %v1287_v41 = vmul.f32 %v2620_v26, %v1242_v14 }
 0x1de   : > { %v1298_v37 = vmax.f32 %v1287_v41, 0.0 }
 0x1e0   : > { %1327 = vperm.xlu1 %2574, %v1298_v37  }
 0x1ed   : > { %v1227_v40 = vpop.permute.xlu0 %1226 }
 0x1ee   : > { %v1244_v4 = vmul.f32 %v1227_v40, %v404_v36 }
 0x1f0   : > { %v1291_v27 = vmul.f32 %v2622_v52, %v1244_v4 }
 0x1f2   : > { %v1300_v21 = vmax.f32 %v1291_v27, 0.0 }
 0x1f4   : > { %1337 = vperm.xlu1 %2574, %v1300_v21  }
 0x1fe   : > { %v1308_v1 = vpop.permute.xlu0 %1307 }
 0x1ff   : > { %v1349_v29 = vmul.f32 %v3753_v63, %v1308_v1 }
 0x202   : > { %v1323_v31 = vpop.permute.xlu0 %1322 }
 0x203   : > { %v1352_v15 = vmul.f32 %v3753_v63, %v1323_v31 }
 0x210   : > { %v1318_v35 = vpop.permute.xlu1 %1317 }
 0x211   : > { %v1351_v8 = vmul.f32 %v3753_v63, %v1318_v35 }
 0x21e   : > { %v2394_v57 = vpop.f32.mrb[0].mxu0 }
 0x21f   : > { %v1452_v18 = vpop.f32.mrb[1].mxu0 }
 0x220   : > { %v1453_v62 = vadd.f32 %v1452_v18, %v1349_v29 }
 0x222   : > { %v1496_v49 = vadd.f32 %v3759_v3, %v1453_v62  ;;  %v2397_v42 = vpop.f32.mrb[2].mxu0 }
 0x223   : > { %v1468_v22 = vadd.f32 %v2397_v42, %v1352_v15  ;;  %v1462_v30 = vpop.f32.mrb[3].mxu0  ;;  %v1333_v48 = vpop.permute.xlu0 %1332  ;;  %v2752_v42 = vmov 0.0  }
 0x224   : > { %v2303_v46 = vmul.f32 -1.442695, %v1496_v49  ;;  %v1463_v43 = vadd.f32 %v1462_v30, %v1351_v8  ;;  %v1354_v61 = vmul.f32 %v3753_v63, %v1333_v48  ;;  %v1744_v48 = vld [vmem:[%s3854_s3 + $0x8] sm:$0xff] }
 0x225   : > { %v1499_v50 = vadd.f32 %v3759_v3, %v1468_v22  ;;  %v3789_v22 = vld [vmem:[%s3856_s5 + $0x1b] ss:$0 sm:$0xff] }
 0x226   : > { %2623 = vpow2.f32 %v2303_v46  ;;  %v1498_v13 = vadd.f32 %v3759_v3, %v1463_v43  ;;  %v2400_v10 = vpop.f32.mrb[4].mxu0 }
 0x227   : > { %v2306_v39 = vmul.f32 -1.442695, %v1499_v50  ;;  %v1472_v54 = vpop.f32.mrb[5].mxu0  ;;  %v1478_v0 = vadd.f32 %v2400_v10, %v1354_v61 }
 0x228   : > { %v2305_v59 = vmul.f32 -1.442695, %v1498_v13 }
 0x229   : > { %2625 = vpow2.f32 %v2306_v39  ;;  %v1501_v20 = vadd.f32 %v3759_v3, %v1478_v0 }
 0x22a   : > { %2627 = vpow2.f32 %v2305_v59  ;;  %v2403_v60 = vpop.f32.mrb[6].mxu0 }
 0x22b   : > { %v1482_v55 = vpop.f32.mrb[7].mxu0  ;;  %v2308_v26 = vmul.f32 -1.442695, %v1501_v20 }
 0x230   : > { %v2624_v23 = vpop.eup %2623 }
 0x231   : > { %v1528_v2 = vadd.f32 1.0, %v2624_v23 }
 0x233   : > { %v2626_v9 = vpop.eup %2625  ;;  %2629 = vrcp.f32 %v1528_v2 }
 0x234   : > { %v2628_v45 = vpop.eup %2627  ;;  %v1531_v16 = vadd.f32 1.0, %v2626_v9 }
 0x235   : > { %v1530_v47 = vadd.f32 1.0, %v2628_v45 }
 0x236   : > { %2631 = vrcp.f32 %v1531_v16 }
 0x237   : > { %2633 = vrcp.f32 %v1530_v47 }
 0x23a   : > { %v1313_v11 = vpop.permute.xlu1 %1312 }
 0x23b   : > { %v1350_v17 = vmul.f32 %v3753_v63, %v1313_v11 }
 0x23d   : > { %v2630_v51 = vpop.eup %2629  ;;  %v1458_v5 = vadd.f32 %v2394_v57, %v1350_v17 }
 0x23e   : > { %2412 = vmatprep.mubr.msk.f32.mxu0 %vm1561_vm1, %v2630_v51 }
 0x23f   : > { %v1497_v24 = vadd.f32 %v3759_v3, %v1458_v5 }
 0x240   : > { %v2632_v44 = vpop.eup %2631 }
 0x241   : > { %v2634_v58 = vpop.eup %2633  ;;  %v2304_v12 = vmul.f32 -1.442695, %v1497_v24 }
 0x242   : > { %2415 = vmatprep.mubr.msk.f32.mxu1 %vm1561_vm1, %v2634_v58 }
 0x243   : > { %2635 = vpow2.f32 %v2304_v12  ;;  %2416 = vmatmul.mubr.msk.f32.vlgmr.msra.gmra.mrb[0].mxu1 %vm1561_vm1, %v2632_v44 }
 0x24c   : > { %v1343_v40 = vpop.permute.xlu0 %1342 }
 0x24d   : > { %v2636_v7 = vpop.eup %2635  ;;  %v1356_v4 = vmul.f32 %v3753_v63, %v1343_v40 }
 0x24e   : > { %v1529_v33 = vadd.f32 1.0, %v2636_v7 }
 0x24f   : > { %v1488_v52 = vadd.f32 %v2403_v60, %v1356_v4 }
 0x250   : > { %2637 = vrcp.f32 %v1529_v33  ;;  %v1743_v33 = vld [vmem:[%s3854_s3] sm:$0xff] }
 0x251   : > { %2639 = vpow2.f32 %v2308_v26  ;;  %v1503_v6 = vadd.f32 %v3759_v3, %v1488_v52 }
 0x253   : > { %v2310_v25 = vmul.f32 -1.442695, %v1503_v6  ;;  %v2040_v6 = vld [vmem:[%s3857_s6] sm:$0xff] }
 0x25a   : > { %v2638_v28 = vpop.eup %2637 }
 0x25b   : > { %2413 = vmatmul.mubr.msk.f32.vlgmr.msra.gmra.mrb[8].mxu0 %vm1561_vm1, %v2638_v28  ;;  %v2640_v27 = vpop.eup %2639 }
 0x25c   : > { %v1533_v38 = vadd.f32 1.0, %v2640_v27  ;;  %2428 = vmatprep.mubr.msk.f32.mxu0 %vm2751_vm7, %v2752_v42 }
 0x25f   : > { %v1328_v53 = vpop.permute.xlu1 %1327 }
 0x260   : > { %v1353_v14 = vmul.f32 %v3753_v63, %v1328_v53 }
 0x262   : > { %v1473_v41 = vadd.f32 %v1472_v54, %v1353_v14 }
 0x264   : > { %v1500_v37 = vadd.f32 %v3759_v3, %v1473_v41 }
 0x266   : > { %v2307_v36 = vmul.f32 -1.442695, %v1500_v37 }
 0x268   : > { %2641 = vpow2.f32 %v2307_v36 }
 0x272   : > { %v2642_v21 = vpop.eup %2641 }
 0x273   : > { %v1532_v34 = vadd.f32 1.0, %v2642_v21  ;;  %v1338_v32 = vpop.permute.xlu1 %1337 }
 0x274   : > { %v1355_v19 = vmul.f32 %v3753_v63, %v1338_v32 }
 0x275   : > { %2643 = vrcp.f32 %v1532_v34  ;;  %v2041_v34 = vld [vmem:[%s3857_s6 + $0x8] sm:$0xff] }
 0x276   : > { %2645 = vrcp.f32 %v1533_v38  ;;  %v1483_v1 = vadd.f32 %v1482_v55, %v1355_v19 }
 0x277   : > { %2647 = vpow2.f32 %v2310_v25  ;;  %v2494_v25 = vpack.c.bf16 %v2041_v34, %v2040_v6 }
 0x278   : > { %v1502_v29 = vadd.f32 %v3759_v3, %v1483_v1  ;;  %v2750_v3 = vmov 0.0|0.0  }
 0x279   : > { %2482 = vmatprep.subr.bf16.mxu0 %v2750_v3  ;;  %2488 = vmatprep.subr.bf16.mxu1 %v2750_v3 }
 0x27a   : > { %v2309_v31 = vmul.f32 -1.442695, %v1502_v29  ;;  %v1745_v29 = vld [vmem:[%s3854_s3 + $0x10] sm:$0xff] }
 0x27c   : > { %2649 = vpow2.f32 %v2309_v31 }
 0x27f   : > { %v2644_v35 = vpop.eup %2643 }
 0x280   : > { %v2646_v57 = vpop.eup %2645  ;;  %2418 = vmatprep.mubr.msk.f32.mxu1 %vm1561_vm1, %v2644_v35 }
 0x281   : > { %2419 = vmatmul.mubr.msk.f32.gmra.mrb[2].mxu1 %vm1561_vm1, %v2646_v57  ;;  %v2648_v18 = vpop.eup %2647 }
 0x282   : > { %v1535_v62 = vadd.f32 1.0, %v2648_v18 }
 0x286   : > { %v2650_v15 = vpop.eup %2649 }
 0x287   : > { %v1534_v8 = vadd.f32 1.0, %v2650_v15 }
 0x289   : > { %2651 = vrcp.f32 %v1534_v8 }
 0x28a   : > { %2653 = vrcp.f32 %v1535_v62 }
 0x293   : > { %v2652_v63 = vpop.eup %2651 }
 0x294   : > { %v2654_v49 = vpop.eup %2653  ;;  %2421 = vmatprep.mubr.msk.f32.mxu1 %vm1561_vm1, %v2652_v63  ;;  %v1746_v63 = vld [vmem:[%s3854_s3 + $0x18] sm:$0xff] }
 0x295   : > { %2422 = vmatmul.mubr.msk.f32.gmra.mrb[4].mxu1 %vm1561_vm1, %v2654_v49  ;;  %v2042_v49 = vld [vmem:[%s3857_s6 + $0x10] sm:$0xff] }
 0x296   : > { %2442 = vmatprep.mubr.msk.f32.mxu1 %vm2751_vm7, %v2752_v42 }
 0x316   : > { %v2417_v30 = vpop.f32.mrb[0].mxu1 }
 0x317   : > { %v1672_v46 = vadd.f32 %v2417_v30, %v3789_v22  ;;  %v1666_v43 = vpop.f32.mrb[1].mxu1 }
 0x318   : > { %v1667_v50 = vadd.f32 %v3789_v22, %v1666_v43 }
 0x319   : > { %v2324_v13 = vmul.f32 -1.442695, %v1672_v46 }
 0x31a   : > { %v2323_v10 = vmul.f32 -1.442695, %v1667_v50 }
 0x31b   : > { %2655 = vpow2.f32 %v2324_v13 }
 0x31c   : > { %2657 = vpow2.f32 %v2323_v10 }
 0x325   : > { %v2656_v39 = vpop.eup %2655 }
 0x326   : > { %v2658_v54 = vpop.eup %2657  ;;  %v1722_v59 = vadd.f32 1.0, %v2656_v39 }
 0x327   : > { %v1721_v60 = vadd.f32 1.0, %v2658_v54 }
 0x328   : > { %2659 = vrcp.f32 %v1722_v59 }
 0x329   : > { %2661 = vrcp.f32 %v1721_v60 }
 0x32e   : > { %v2414_v55 = vpop.f32.mrb[8].mxu0 }
 0x32f   : > { %v1662_v23 = vadd.f32 %v2414_v55, %v3789_v22  ;;  %v1656_v2 = vpop.f32.mrb[9].mxu0 }
 0x330   : > { %v1657_v9 = vadd.f32 %v3789_v22, %v1656_v2 }
 0x331   : > { %v2322_v45 = vmul.f32 -1.442695, %v1662_v23 }
 0x332   : > { %v2660_v16 = vpop.eup %2659  ;;  %v2321_v47 = vmul.f32 -1.442695, %v1657_v9 }
 0x333   : > { %v2662_v11 = vpop.eup %2661  ;;  %2663 = vpow2.f32 %v2322_v45 }
 0x334   : > { %2665 = vpow2.f32 %v2321_v47  ;;  %v2486_v17 = vpack.c.bf16 %v2660_v16, %v2662_v11 }
 0x33d   : > { %v2664_v51 = vpop.eup %2663 }
 0x33e   : > { %v2666_v5 = vpop.eup %2665  ;;  %v1720_v24 = vadd.f32 1.0, %v2664_v51 }
 0x33f   : > { %v1719_v44 = vadd.f32 1.0, %v2666_v5 }
 0x340   : > { %2667 = vrcp.f32 %v1720_v24 }
 0x341   : > { %2669 = vrcp.f32 %v1719_v44 }
 0x34a   : > { %v2668_v58 = vpop.eup %2667 }
 0x34b   : > { %v2670_v12 = vpop.eup %2669 }
 0x34c   : > { %v2483_v7 = vpack.c.bf16 %v2668_v58, %v2670_v12 }
 0x34e   : > { %2484 = vmatpush3.bf16.msra.mxu0 %v2483_v7 }
 0x34f   : > { %2485 = vmatprep.subr.bf16.mxu0 %v2750_v3 }
 0x351   : > { %2429 = vmatmul.mubr.msk.f32.vlgmr.msra.gmra.mrb[10].mxu0 %vm1747_vm8, %v1743_v33 }
 0x352   : > { %2487 = vmatpush3.bf16.msra.mxu0 %v2486_v17  ;;  %2435 = vmatprep.mubr.msk.f32.mxu0 %vm2751_vm7, %v2752_v42 }
 0x353   : > { %2491 = vmatprep.subr.bf16.mxu0 %v2750_v3  ;;  %v2043_v3 = vld [vmem:[%s3857_s6 + $0x18] sm:$0x7] }
 0x354   : > { %v2420_v61 = vpop.f32.mrb[2].mxu1 }
 0x355   : > { %2436 = vmatmul.mubr.msk.f32.vlgmr.msra.gmra.mrb[12].mxu0 %vm1747_vm8, %v1744_v48  ;;  %v1682_v28 = vadd.f32 %v2420_v61, %v3789_v22  ;;  %v1676_v0 = vpop.f32.mrb[3].mxu1 }
 0x356   : > { %2449 = vmatprep.mubr.msk.f32.mxu0 %vm2751_vm7, %v2752_v42  ;;  %v1677_v20 = vadd.f32 %v3789_v22, %v1676_v0  ;;  %v2498_v42 = vpack.c.bf16 %v2043_v3, %v2042_v49 }
 0x357   : > { %v2326_v53 = vmul.f32 -1.442695, %v1682_v28 }
 0x358   : > { %v2325_v14 = vmul.f32 -1.442695, %v1677_v20 }
 0x359   : > { %2671 = vpow2.f32 %v2326_v53 }
 0x35a   : > { %2673 = vpow2.f32 %v2325_v14 }
 0x363   : > { %v2672_v26 = vpop.eup %2671 }
 0x364   : > { %v2674_v41 = vpop.eup %2673  ;;  %v1724_v37 = vadd.f32 1.0, %v2672_v26 }
 0x365   : > { %v1723_v36 = vadd.f32 1.0, %v2674_v41 }
 0x366   : > { %2675 = vrcp.f32 %v1724_v37 }
 0x367   : > { %2677 = vrcp.f32 %v1723_v36 }
 0x368   : > { %v2423_v40 = vpop.f32.mrb[4].mxu1 }
 0x369   : > { %v1692_v4 = vadd.f32 %v2423_v40, %v3789_v22  ;;  %v1686_v52 = vpop.f32.mrb[5].mxu1 }
 0x36a   : > { %v1687_v27 = vadd.f32 %v3789_v22, %v1686_v52 }
 0x36b   : > { %v2328_v21 = vmul.f32 -1.442695, %v1692_v4 }
 0x36c   : > { %v2327_v38 = vmul.f32 -1.442695, %v1687_v27 }
 0x36d   : > { %2679 = vpow2.f32 %v2328_v21 }
 0x36e   : > { %2681 = vpow2.f32 %v2327_v38 }
 0x370   : > { %v2676_v32 = vpop.eup %2675 }
 0x371   : > { %v2678_v19 = vpop.eup %2677 }
 0x372   : > { %v2489_v1 = vpack.c.bf16 %v2676_v32, %v2678_v19 }
 0x374   : > { %2490 = vmatpush3.bf16.msra.mxu1 %v2489_v1 }
 0x375   : > { %2495 = vmatprep.subr.bf16.mxu1 %v2494_v25 }
 0x377   : > { %2443 = vmatmul.mubr.msk.f32.vlgmr.msra.gmra.mrb[6].mxu1 %vm1747_vm8, %v1745_v29  ;;  %v2680_v31 = vpop.eup %2679 }
 0x378   : > { %2497 = vmatpush3.bf16.msra.mxu1 %v2494_v25  ;;  %v2682_v35 = vpop.eup %2681  ;;  %v1726_v57 = vadd.f32 1.0, %v2680_v31 }
 0x379   : > { %v1725_v18 = vadd.f32 1.0, %v2682_v35  ;;  %2500 = vmatprep.subr.msk.bf16.mxu1 %vm3738_vm6, %v2498_v42 }
 0x37a   : > { %2683 = vrcp.f32 %v1726_v57 }
 0x37b   : > { %2685 = vrcp.f32 %v1725_v18 }
 0x37c   : > { %2503 = vmatpush3.bf16.msk.msra.mxu1 %vm3738_vm6, %v2498_v42 }
 0x384   : > { %v2684_v15 = vpop.eup %2683 }
 0x385   : > { %v2686_v62 = vpop.eup %2685 }
 0x386   : > { %v2492_v8 = vpack.c.bf16 %v2684_v15, %v2686_v62 }
 0x388   : > { %2493 = vmatpush3.bf16.msra.mxu0 %v2492_v8 }
 0x38b   : > { %2450 = vmatmul.mubr.msk.f32.vlgmr.msra.gmra.mrb[14].mxu0 %vm1747_vm8, %v1746_v63 }
 0x424   : > { %v1817_v22 = vpop.f32.mrb[10].mxu0 }
 0x425   : > { %v2430_v30 = vpop.f32.mrb[11].mxu0  ;;  %2460 = vmatprep.mubr.msk.f32.mxu1 %vm1561_vm1, %v1817_v22 }
 0x428   : > { %v1890_v46 = vpop.f32.mrb[12].mxu0 }
 0x429   : > { %2461 = vmatmul.mubr.msk.f32.vlgmr.msra.gmra.mrb[8].mxu1 %vm1561_vm1, %v1890_v46  ;;  %v2437_v43 = vpop.f32.mrb[13].mxu0 }
 0x44a   : > { %v1963_v50 = vpop.f32.mrb[6].mxu1 }
 0x44b   : > { %2463 = vmatprep.mubr.msk.f32.mxu1 %vm1561_vm1, %v1963_v50  ;;  %v2444_v13 = vpop.f32.mrb[7].mxu1 }
 0x45e   : > { %v2036_v10 = vpop.f32.mrb[14].mxu0 }
 0x45f   : > { %2464 = vmatmul.mubr.msk.f32.gmra.mrb[10].mxu1 %vm1561_vm1, %v2036_v10  ;;  %v2451_v39 = vpop.f32.mrb[15].mxu0 }
 0x4fc   : > { %v2462_v54 = vpop.f32.mrb[8].mxu1 }
 0x4fd   : > { %v2136_v59 = vadd.f32 %v2462_v54, %v2333_v56  ;;  %v2130_v60 = vpop.f32.mrb[9].mxu1 }
 0x4fe   : > { %v2131_v55 = vadd.f32 %v2333_v56, %v2130_v60 }
 0x4ff   : > { %v2340_v23 = vmul.f32 -1.442695, %v2136_v59 }
 0x500   : > { %v2339_v2 = vmul.f32 -1.442695, %v2131_v55 }
 0x501   : > { %2687 = vpow2.f32 %v2340_v23 }
 0x502   : > { %2689 = vpow2.f32 %v2339_v2 }
 0x50b   : > { %v2688_v9 = vpop.eup %2687 }
 0x50c   : > { %v2690_v45 = vpop.eup %2689  ;;  %v2162_v16 = vadd.f32 1.0, %v2688_v9 }
 0x50d   : > { %v2161_v47 = vadd.f32 1.0, %v2690_v45 }
 0x50e   : > { %2691 = vrcp.f32 %v2162_v16 }
 0x50f   : > { %2693 = vrcp.f32 %v2161_v47 }
 0x518   : > { %v2692_v11 = vpop.eup %2691 }
 0x519   : > { %v2694_v17 = vpop.eup %2693  ;;  %2175 = vst.msk [vmem:[%s292_s14 + $0x8] sm:$0xff] %vm2173_vm9, %v2692_v11 }
 0x51a   : > { %2174 = vst.msk [vmem:[%s292_s14] sm:$0xff] %vm2173_vm9, %v2694_v17 }
 0x532   : > { %v2465_v51 = vpop.f32.mrb[10].mxu1 }
 0x533   : > { %v2146_v5 = vadd.f32 %v2465_v51, %v2333_v56  ;;  %v2140_v24 = vpop.f32.mrb[11].mxu1 }
 0x534   : > { %v2141_v44 = vadd.f32 %v2333_v56, %v2140_v24 }
 0x535   : > { %v2342_v58 = vmul.f32 -1.442695, %v2146_v5 }
 0x536   : > { %v2341_v12 = vmul.f32 -1.442695, %v2141_v44 }
 0x537   : > { %2695 = vpow2.f32 %v2342_v58 }
 0x538   : > { %2697 = vpow2.f32 %v2341_v12 }
 0x541   : > { %v2696_v7 = vpop.eup %2695 }
 0x542   : > { %v2698_v33 = vpop.eup %2697  ;;  %v2164_v48 = vadd.f32 1.0, %v2696_v7 }
 0x543   : > { %v2163_v61 = vadd.f32 1.0, %v2698_v33 }
 0x545   : > { %2699 = vrcp.f32 %v2163_v61 }
 0x546   : > { %2701 = vrcp.f32 %v2164_v48 }
 0x54f   : > { %v2700_v28 = vpop.eup %2699 }
 0x550   : > { %v2702_v0 = vpop.eup %2701  ;;  %2176 = vst.msk [vmem:[%s292_s14 + $0x10] sm:$0xff] %vm2173_vm9, %v2700_v28 }
 0x551   : > { %2177 = vst.msk [vmem:[%s292_s14 + $0x18] sm:$0xff] %vm2173_vm9, %v2702_v0 }
 0x552 PF: > { %s18_s24 = sadd.s32 1, %s2736_s24  }
 0x553   : > { %p15_p2 = scmp.ge.s32.totalorder %s18_s24, 4  }
 0x555   :  { %17 = sbr.rel (!%p15_p2) target bundleno = 1 (0x1), region = 83 }
 0x55c   :  { %2200 = vsyncpa [#allocation3], 1 }
 0x55d   :  { %2202 = vsyncpa [#allocation3 + $0x1], 1 }

</bundles_post_ra>
